<compile_context>
chip_gen: v7x
topology: tpu7x:2x2x1
jax: 0.10.0
libtpu: 0.0.40
codegen_flags: <defaults>
</compile_context>

<pallas_src>
import functools

import jax
import jax.numpy as jnp
from jax.experimental import pallas as pl
from jax.experimental.pallas import tpu as pltpu

_EPS = 1e-5
_NEG_SLOPE = 0.2


def _resnet_block_kernel(xg_ref, mask_ref, w1_ref, g1_ref, b1_ref,
                         w2_ref, g2_ref, b2_ref, o_ref, y1_ref, patch_ref,
                         *, B, Cp, H, W, PFp, G):
    """Fused ResnetBlock forward.

    xg_ref   : (B*Cp, L)      guarded+padded input rows, L = G + PFp + G
    mask_ref : (1, B*PFp)     1.0 at valid (non-padding, non-tail) positions
    w*_ref   : (Cp, 9*Cp)     conv weights, column index = (kh*3+kw)*Cp + cin
    g*/b*    : (Cp, 1)        BN gamma / beta
    o_ref    : (B*Cp, PFp)    output in padded coords (wrapper slices valid part)
    y1_ref   : (B*Cp, L)      VMEM scratch holding stage-1 output (padded layout)
    patch_ref: (9*Cp, B*PFp)  VMEM im2col scratch (batched over B, reused/stage)
    """
    Hp, Wp = H + 2, W + 2
    PF = Hp * Wp
    inv_n = 1.0 / float(B * H * W)

    # tap k = kh*3 + kw  ->  lane offset in the flattened padded plane
    offs = [(kh - 1) * Wp + (kw - 1) for kh in range(3) for kw in range(3)]
    valid = mask_ref[...] != 0.0                           # (1, B*PFp) bool

    def conv(src_ref, wmat):
        """3x3 conv for all images as ONE im2col matmul -> (Cp, B*PFp) f32."""
        for b in range(B):
            rows = src_ref[b * Cp:(b + 1) * Cp, :]         # (Cp, L)
            for k, off in enumerate(offs):
                # destination sublane/lane offsets are multiples of 8 / 128
                patch_ref[k * Cp:(k + 1) * Cp, b * PFp:(b + 1) * PFp] = \
                    rows[:, G + off:G + off + PFp]
        return jnp.dot(wmat, patch_ref[...], preferred_element_type=jnp.float32)

    def bn_affine(acc, gamma, beta):
        """One-pass masked batch stats -> per-channel scale/shift (Cp, 1)."""
        am = jnp.where(valid, acc, 0.0)
        s = jnp.sum(am, axis=1, keepdims=True)
        ss = jnp.sum(am * am, axis=1, keepdims=True)
        mean = s * inv_n
        var = jnp.maximum(ss * inv_n - mean * mean, 0.0)   # biased, clamped
        scale = jax.lax.rsqrt(var + _EPS) * gamma
        return scale, beta - mean * scale

    # Zero only the lane guards of y1 (aligned full-vreg stores).  Interior
    # padding positions are zeroed below via the valid mask.
    n_rows = B * Cp
    y1_ref[:, :G] = jnp.zeros((n_rows, G), jnp.float32)
    y1_ref[:, G + PFp:] = jnp.zeros((n_rows, G), jnp.float32)

    # ---- stage 1: conv1 -> bn1 -> LeakyReLU(0.2), kept in VMEM scratch ----
    acc1 = conv(xg_ref, w1_ref[...])                       # (Cp, B*PFp)
    sc1, sh1 = bn_affine(acc1, g1_ref[...], b1_ref[...])
    y1 = acc1 * sc1 + sh1
    y1 = jnp.maximum(y1, _NEG_SLOPE * y1)                  # LeakyReLU(0.2)
    y1 = jnp.where(valid, y1, 0.0)                         # zero padding + tail
    for b in range(B):                                     # 128-aligned stores
        y1_ref[b * Cp:(b + 1) * Cp, G:G + PFp] = y1[:, b * PFp:(b + 1) * PFp]

    # ---- stage 2: conv2 -> bn2 -> + x (residual from the padded input) ----
    acc2 = conv(y1_ref, w2_ref[...])                       # (Cp, B*PFp)
    sc2, sh2 = bn_affine(acc2, g2_ref[...], b2_ref[...])
    y2 = acc2 * sc2 + sh2
    for b in range(B):
        res = xg_ref[b * Cp:(b + 1) * Cp, G:G + PFp]       # aligned load
        o_ref[b * Cp:(b + 1) * Cp, :] = \
            (y2[:, b * PFp:(b + 1) * PFp] + res).astype(o_ref.dtype)


@jax.jit
def resnet_block(x, w1, g1, b1, w2, g2, b2):
    """Forward pass of ResnetBlock.  x: [b, d, h, w] float32 (NCHW)."""
    B, C, H, W = x.shape
    Cp = -(-C // 8) * 8                                    # channels -> sublane group
    Hp, Wp = H + 2, W + 2
    PF = Hp * Wp                                           # flattened padded plane
    PFp = -(-PF // 128) * 128                              # lane-dense plane width
    G = max(128, -(-(Wp + 1) // 128) * 128)                # 128-aligned lane guard
    L = G + PFp + G

    # NCHW -> (B*Cp, L): pad channels, zero-pad the spatial plane, flatten it
    # onto lanes, add aligned lane guards.  Reshapes/pads only — no transposes.
    xp = jnp.pad(x.astype(jnp.float32), ((0, 0), (0, Cp - C), (1, 1), (1, 1)))
    xg = jnp.pad(xp.reshape(B * Cp, PF), ((0, 0), (G, L - G - PF)))

    def wmat(w):                                           # torch OIHW -> (Cp, 9*Cp)
        wt = jnp.transpose(w, (0, 2, 3, 1))                # (co, kh, kw, ci)
        wt = jnp.pad(wt, ((0, Cp - C), (0, 0), (0, 0), (0, Cp - C)))
        return wt.reshape(Cp, 9 * Cp).astype(jnp.float32)

    def cvec(v):                                           # (C,) -> (Cp, 1)
        return jnp.pad(v.astype(jnp.float32), (0, Cp - C)).reshape(Cp, 1)

    hp_i = jnp.arange(Hp)
    wp_i = jnp.arange(Wp)
    mask2d = (((hp_i >= 1) & (hp_i <= H))[:, None]
              & ((wp_i >= 1) & (wp_i <= W))[None, :])
    mask1 = jnp.pad(mask2d.reshape(1, PF).astype(jnp.float32),
                    ((0, 0), (0, PFp - PF)))               # (1, PFp), zero tail
    mask = jnp.tile(mask1, (1, B))                         # (1, B*PFp)

    kernel = functools.partial(_resnet_block_kernel,
                               B=B, Cp=Cp, H=H, W=W, PFp=PFp, G=G)
    out = pl.pallas_call(
        kernel,
        out_shape=jax.ShapeDtypeStruct((B * Cp, PFp), x.dtype),
        in_specs=[pl.BlockSpec(memory_space=pltpu.MemorySpace.VMEM)] * 8,
        out_specs=pl.BlockSpec(memory_space=pltpu.MemorySpace.VMEM),
        scratch_shapes=[pltpu.VMEM((B * Cp, L), jnp.float32),      # y1 (padded)
                        pltpu.VMEM((9 * Cp, B * PFp), jnp.float32)],  # im2col
    )(xg, mask, wmat(w1), cvec(g1), cvec(b1), wmat(w2), cvec(g2), cvec(b2))

    # (B*Cp, PFp) padded coords -> NCHW valid region.
    return (out.reshape(B, Cp, PFp)[:, :C, :PF]
               .reshape(B, C, Hp, Wp)[:, :, 1:H + 1, 1:W + 1])


def _reference(x_nchw, w1, g1, b1, w2, g2, b2):
    """Pure-JAX NCHW reference mirroring the PyTorch module."""
    def conv(x, w):
        return jax.lax.conv_general_dilated(
            x, w, window_strides=(1, 1), padding=((1, 1), (1, 1)),
            dimension_numbers=("NCHW", "OIHW", "NCHW"),
            precision=jax.lax.Precision.HIGHEST)

    def bn(y, g, b):
        mean = jnp.mean(y, axis=(0, 2, 3), keepdims=True)
        var = jnp.mean((y - mean) ** 2, axis=(0, 2, 3), keepdims=True)
        return ((y - mean) * jax.lax.rsqrt(var + _EPS) * g.reshape(1, -1, 1, 1)
                + b.reshape(1, -1, 1, 1))

    y = conv(x_nchw, w1)
    y = bn(y, g1, b1)
    y = jnp.where(y >= 0, y, _NEG_SLOPE * y)
    y = conv(y, w2)
    y = bn(y, g2, b2)
    return x_nchw + y


if __name__ == "__main__":
    B, C, H, W = 2, 4, 16, 16
    key = jax.random.PRNGKey(0)
    ks = jax.random.split(key, 7)

    x = jax.random.normal(ks[0], (B, C, H, W), jnp.float32)
    w1 = 0.2 * jax.random.normal(ks[1], (C, C, 3, 3), jnp.float32)
    w2 = 0.2 * jax.random.normal(ks[2], (C, C, 3, 3), jnp.float32)
    g1 = 1.0 + 0.1 * jax.random.normal(ks[3], (C,), jnp.float32)
    b1 = 0.1 * jax.random.normal(ks[4], (C,), jnp.float32)
    g2 = 1.0 + 0.1 * jax.random.normal(ks[5], (C,), jnp.float32)
    b2 = 0.1 * jax.random.normal(ks[6], (C,), jnp.float32)

    out = resnet_block(x, w1, g1, b1, w2, g2, b2)
    out = jax.block_until_ready(out)

    assert out.shape == x.shape and out.dtype == x.dtype
    ref = _reference(x, w1, g1, b1, w2, g2, b2)
    max_err = float(jnp.max(jnp.abs(out - ref)))
    if max_err > 5e-2:
        raise AssertionError(f"kernel mismatch vs reference: max abs err = {max_err}")

    print("KERNEL_OK")
</pallas_src>

<mosaic_0001>
module attributes {stable_mosaic.version = 11 : i64} {
  func.func @_resnet_block_kernel(%arg0: memref<16x640xf32, #tpu.memory_space<vmem>>, %arg1: memref<1x768xf32, #tpu.memory_space<vmem>>, %arg2: memref<8x72xf32, #tpu.memory_space<vmem>>, %arg3: memref<8x1xf32, #tpu.memory_space<vmem>>, %arg4: memref<8x1xf32, #tpu.memory_space<vmem>>, %arg5: memref<8x72xf32, #tpu.memory_space<vmem>>, %arg6: memref<8x1xf32, #tpu.memory_space<vmem>>, %arg7: memref<8x1xf32, #tpu.memory_space<vmem>>, %arg8: memref<16x384xf32, #tpu.memory_space<vmem>>, %arg9: memref<16x640xf32, #tpu.memory_space<vmem>>, %arg10: memref<72x768xf32, #tpu.memory_space<vmem>>) attributes {dimension_semantics = [], scalar_prefetch = 0 : i64, scratch_operands = 2 : i64, tpu.core_type = #tpu.core_type<tc>} {
    %c0 = arith.constant 0 : index
    %c0_0 = arith.constant 0 : index
    %0 = vector.load %arg1[%c0, %c0_0] : memref<1x768xf32, #tpu.memory_space<vmem>>, vector<1x768xf32>
    %cst = arith.constant 0.000000e+00 : f32
    %1 = vector.broadcast %cst : f32 to vector<1x768xf32>
    %2 = arith.cmpf one, %0, %1 : vector<1x768xf32>
    %cst_1 = arith.constant 0.000000e+00 : f32
    %3 = vector.broadcast %cst_1 : f32 to vector<16x128xf32>
    %c0_2 = arith.constant 0 : index
    %c0_3 = arith.constant 0 : index
    %4 = vector.load %arg9[%c0_2, %c0_3] : memref<16x640xf32, #tpu.memory_space<vmem>>, vector<16x128xf32>
    tpu.vector_store %arg9[%c0_2, %c0_3], %3 {strides = array<i32>} : memref<16x640xf32, #tpu.memory_space<vmem>>, vector<16x128xf32>,
    %cst_4 = arith.constant 0.000000e+00 : f32
    %5 = vector.broadcast %cst_4 : f32 to vector<16x128xf32>
    %c0_5 = arith.constant 0 : index
    %c512 = arith.constant 512 : index
    %6 = vector.load %arg9[%c0_5, %c512] : memref<16x640xf32, #tpu.memory_space<vmem>>, vector<16x128xf32>
    tpu.vector_store %arg9[%c0_5, %c512], %5 {strides = array<i32>} : memref<16x640xf32, #tpu.memory_space<vmem>>, vector<16x128xf32>,
    %c0_6 = arith.constant 0 : index
    %c0_7 = arith.constant 0 : index
    %7 = vector.load %arg2[%c0_6, %c0_7] : memref<8x72xf32, #tpu.memory_space<vmem>>, vector<8x72xf32>
    %c0_8 = arith.constant 0 : index
    %c0_9 = arith.constant 0 : index
    %8 = vector.load %arg0[%c0_8, %c0_9] : memref<16x640xf32, #tpu.memory_space<vmem>>, vector<8x640xf32>
    %9 = vector.extract_strided_slice %8 {offsets = [0, 109], sizes = [8, 384], strides = [1, 1]} : vector<8x640xf32> to vector<8x384xf32>
    %c0_10 = arith.constant 0 : index
    %c0_11 = arith.constant 0 : index
    %10 = vector.load %arg10[%c0_10, %c0_11] : memref<72x768xf32, #tpu.memory_space<vmem>>, vector<8x384xf32>
    tpu.vector_store %arg10[%c0_10, %c0_11], %9 {strides = array<i32>} : memref<72x768xf32, #tpu.memory_space<vmem>>, vector<8x384xf32>,
    %11 = vector.extract_strided_slice %8 {offsets = [0, 110], sizes = [8, 384], strides = [1, 1]} : vector<8x640xf32> to vector<8x384xf32>
    %c8 = arith.constant 8 : index
    %c0_12 = arith.constant 0 : index
    %12 = vector.load %arg10[%c8, %c0_12] : memref<72x768xf32, #tpu.memory_space<vmem>>, vector<8x384xf32>
    tpu.vector_store %arg10[%c8, %c0_12], %11 {strides = array<i32>} : memref<72x768xf32, #tpu.memory_space<vmem>>, vector<8x384xf32>,
    %13 = vector.extract_strided_slice %8 {offsets = [0, 111], sizes = [8, 384], strides = [1, 1]} : vector<8x640xf32> to vector<8x384xf32>
    %c16 = arith.constant 16 : index
    %c0_13 = arith.constant 0 : index
    %14 = vector.load %arg10[%c16, %c0_13] : memref<72x768xf32, #tpu.memory_space<vmem>>, vector<8x384xf32>
    tpu.vector_store %arg10[%c16, %c0_13], %13 {strides = array<i32>} : memref<72x768xf32, #tpu.memory_space<vmem>>, vector<8x384xf32>,
    %15 = vector.extract_strided_slice %8 {offsets = [0, 127], sizes = [8, 384], strides = [1, 1]} : vector<8x640xf32> to vector<8x384xf32>
    %c24 = arith.constant 24 : index
    %c0_14 = arith.constant 0 : index
    %16 = vector.load %arg10[%c24, %c0_14] : memref<72x768xf32, #tpu.memory_space<vmem>>, vector<8x384xf32>
    tpu.vector_store %arg10[%c24, %c0_14], %15 {strides = array<i32>} : memref<72x768xf32, #tpu.memory_space<vmem>>, vector<8x384xf32>,
    %17 = vector.extract_strided_slice %8 {offsets = [0, 128], sizes = [8, 384], strides = [1, 1]} : vector<8x640xf32> to vector<8x384xf32>
    %c32 = arith.constant 32 : index
    %c0_15 = arith.constant 0 : index
    %18 = vector.load %arg10[%c32, %c0_15] : memref<72x768xf32, #tpu.memory_space<vmem>>, vector<8x384xf32>
    tpu.vector_store %arg10[%c32, %c0_15], %17 {strides = array<i32>} : memref<72x768xf32, #tpu.memory_space<vmem>>, vector<8x384xf32>,
    %19 = vector.extract_strided_slice %8 {offsets = [0, 129], sizes = [8, 384], strides = [1, 1]} : vector<8x640xf32> to vector<8x384xf32>
    %c40 = arith.constant 40 : index
    %c0_16 = arith.constant 0 : index
    %20 = vector.load %arg10[%c40, %c0_16] : memref<72x768xf32, #tpu.memory_space<vmem>>, vector<8x384xf32>
    tpu.vector_store %arg10[%c40, %c0_16], %19 {strides = array<i32>} : memref<72x768xf32, #tpu.memory_space<vmem>>, vector<8x384xf32>,
    %21 = vector.extract_strided_slice %8 {offsets = [0, 145], sizes = [8, 384], strides = [1, 1]} : vector<8x640xf32> to vector<8x384xf32>
    %c48 = arith.constant 48 : index
    %c0_17 = arith.constant 0 : index
    %22 = vector.load %arg10[%c48, %c0_17] : memref<72x768xf32, #tpu.memory_space<vmem>>, vector<8x384xf32>
    tpu.vector_store %arg10[%c48, %c0_17], %21 {strides = array<i32>} : memref<72x768xf32, #tpu.memory_space<vmem>>, vector<8x384xf32>,
    %23 = vector.extract_strided_slice %8 {offsets = [0, 146], sizes = [8, 384], strides = [1, 1]} : vector<8x640xf32> to vector<8x384xf32>
    %c56 = arith.constant 56 : index
    %c0_18 = arith.constant 0 : index
    %24 = vector.load %arg10[%c56, %c0_18] : memref<72x768xf32, #tpu.memory_space<vmem>>, vector<8x384xf32>
    tpu.vector_store %arg10[%c56, %c0_18], %23 {strides = array<i32>} : memref<72x768xf32, #tpu.memory_space<vmem>>, vector<8x384xf32>,
    %25 = vector.extract_strided_slice %8 {offsets = [0, 147], sizes = [8, 384], strides = [1, 1]} : vector<8x640xf32> to vector<8x384xf32>
    %c64 = arith.constant 64 : index
    %c0_19 = arith.constant 0 : index
    %26 = vector.load %arg10[%c64, %c0_19] : memref<72x768xf32, #tpu.memory_space<vmem>>, vector<8x384xf32>
    tpu.vector_store %arg10[%c64, %c0_19], %25 {strides = array<i32>} : memref<72x768xf32, #tpu.memory_space<vmem>>, vector<8x384xf32>,
    %c8_20 = arith.constant 8 : index
    %c0_21 = arith.constant 0 : index
    %27 = vector.load %arg0[%c8_20, %c0_21] : memref<16x640xf32, #tpu.memory_space<vmem>>, vector<8x640xf32>
    %28 = vector.extract_strided_slice %27 {offsets = [0, 109], sizes = [8, 384], strides = [1, 1]} : vector<8x640xf32> to vector<8x384xf32>
    %c0_22 = arith.constant 0 : index
    %c384 = arith.constant 384 : index
    %29 = vector.load %arg10[%c0_22, %c384] : memref<72x768xf32, #tpu.memory_space<vmem>>, vector<8x384xf32>
    tpu.vector_store %arg10[%c0_22, %c384], %28 {strides = array<i32>} : memref<72x768xf32, #tpu.memory_space<vmem>>, vector<8x384xf32>,
    %30 = vector.extract_strided_slice %27 {offsets = [0, 110], sizes = [8, 384], strides = [1, 1]} : vector<8x640xf32> to vector<8x384xf32>
    %c8_23 = arith.constant 8 : index
    %c384_24 = arith.constant 384 : index
    %31 = vector.load %arg10[%c8_23, %c384_24] : memref<72x768xf32, #tpu.memory_space<vmem>>, vector<8x384xf32>
    tpu.vector_store %arg10[%c8_23, %c384_24], %30 {strides = array<i32>} : memref<72x768xf32, #tpu.memory_space<vmem>>, vector<8x384xf32>,
    %32 = vector.extract_strided_slice %27 {offsets = [0, 111], sizes = [8, 384], strides = [1, 1]} : vector<8x640xf32> to vector<8x384xf32>
    %c16_25 = arith.constant 16 : index
    %c384_26 = arith.constant 384 : index
    %33 = vector.load %arg10[%c16_25, %c384_26] : memref<72x768xf32, #tpu.memory_space<vmem>>, vector<8x384xf32>
    tpu.vector_store %arg10[%c16_25, %c384_26], %32 {strides = array<i32>} : memref<72x768xf32, #tpu.memory_space<vmem>>, vector<8x384xf32>,
    %34 = vector.extract_strided_slice %27 {offsets = [0, 127], sizes = [8, 384], strides = [1, 1]} : vector<8x640xf32> to vector<8x384xf32>
    %c24_27 = arith.constant 24 : index
    %c384_28 = arith.constant 384 : index
    %35 = vector.load %arg10[%c24_27, %c384_28] : memref<72x768xf32, #tpu.memory_space<vmem>>, vector<8x384xf32>
    tpu.vector_store %arg10[%c24_27, %c384_28], %34 {strides = array<i32>} : memref<72x768xf32, #tpu.memory_space<vmem>>, vector<8x384xf32>,
    %36 = vector.extract_strided_slice %27 {offsets = [0, 128], sizes = [8, 384], strides = [1, 1]} : vector<8x640xf32> to vector<8x384xf32>
    %c32_29 = arith.constant 32 : index
    %c384_30 = arith.constant 384 : index
    %37 = vector.load %arg10[%c32_29, %c384_30] : memref<72x768xf32, #tpu.memory_space<vmem>>, vector<8x384xf32>
    tpu.vector_store %arg10[%c32_29, %c384_30], %36 {strides = array<i32>} : memref<72x768xf32, #tpu.memory_space<vmem>>, vector<8x384xf32>,
    %38 = vector.extract_strided_slice %27 {offsets = [0, 129], sizes = [8, 384], strides = [1, 1]} : vector<8x640xf32> to vector<8x384xf32>
    %c40_31 = arith.constant 40 : index
    %c384_32 = arith.constant 384 : index
    %39 = vector.load %arg10[%c40_31, %c384_32] : memref<72x768xf32, #tpu.memory_space<vmem>>, vector<8x384xf32>
    tpu.vector_store %arg10[%c40_31, %c384_32], %38 {strides = array<i32>} : memref<72x768xf32, #tpu.memory_space<vmem>>, vector<8x384xf32>,
    %40 = vector.extract_strided_slice %27 {offsets = [0, 145], sizes = [8, 384], strides = [1, 1]} : vector<8x640xf32> to vector<8x384xf32>
    %c48_33 = arith.constant 48 : index
    %c384_34 = arith.constant 384 : index
    %41 = vector.load %arg10[%c48_33, %c384_34] : memref<72x768xf32, #tpu.memory_space<vmem>>, vector<8x384xf32>
    tpu.vector_store %arg10[%c48_33, %c384_34], %40 {strides = array<i32>} : memref<72x768xf32, #tpu.memory_space<vmem>>, vector<8x384xf32>,
    %42 = vector.extract_strided_slice %27 {offsets = [0, 146], sizes = [8, 384], strides = [1, 1]} : vector<8x640xf32> to vector<8x384xf32>
    %c56_35 = arith.constant 56 : index
    %c384_36 = arith.constant 384 : index
    %43 = vector.load %arg10[%c56_35, %c384_36] : memref<72x768xf32, #tpu.memory_space<vmem>>, vector<8x384xf32>
    tpu.vector_store %arg10[%c56_35, %c384_36], %42 {strides = array<i32>} : memref<72x768xf32, #tpu.memory_space<vmem>>, vector<8x384xf32>,
    %44 = vector.extract_strided_slice %27 {offsets = [0, 147], sizes = [8, 384], strides = [1, 1]} : vector<8x640xf32> to vector<8x384xf32>
    %c64_37 = arith.constant 64 : index
    %c384_38 = arith.constant 384 : index
    %45 = vector.load %arg10[%c64_37, %c384_38] : memref<72x768xf32, #tpu.memory_space<vmem>>, vector<8x384xf32>
    tpu.vector_store %arg10[%c64_37, %c384_38], %44 {strides = array<i32>} : memref<72x768xf32, #tpu.memory_space<vmem>>, vector<8x384xf32>,
    %c0_39 = arith.constant 0 : index
    %c0_40 = arith.constant 0 : index
    %46 = vector.load %arg10[%c0_39, %c0_40] : memref<72x768xf32, #tpu.memory_space<vmem>>, vector<72x768xf32>
    %cst_41 = arith.constant dense<0.000000e+00> : vector<8x768xf32>
    %47 = tpu.matmul %7, %46, %cst_41 {dimension_numbers = #tpu.dot_dimension_numbers<[1], [0], [0], [1], [0, 0, 1, 1], [], []>} : vector<8x72xf32>, vector<72x768xf32>, vector<8x768xf32> -> vector<8x768xf32>
    %c0_42 = arith.constant 0 : index
    %c0_43 = arith.constant 0 : index
    %48 = vector.load %arg3[%c0_42, %c0_43] : memref<8x1xf32, #tpu.memory_space<vmem>>, vector<8x1xf32>
    %c0_44 = arith.constant 0 : index
    %c0_45 = arith.constant 0 : index
    %49 = vector.load %arg4[%c0_44, %c0_45] : memref<8x1xf32, #tpu.memory_space<vmem>>, vector<8x1xf32>
    %cst_46 = arith.constant 0.000000e+00 : f32
    %50 = vector.shape_cast %2 : vector<1x768xi1> to vector<1x768xi1>
    %51 = vector.broadcast %50 : vector<1x768xi1> to vector<8x768xi1>
    %52 = vector.broadcast %cst_46 : f32 to vector<8x768xf32>
    %53 = arith.select %51, %47, %52 : vector<8x768xi1>, vector<8x768xf32>
    %cst_47 = arith.constant dense<0.000000e+00> : vector<8xf32>
    %54 = vector.multi_reduction <add>, %53, %cst_47 [1] : vector<8x768xf32> to vector<8xf32>
    %55 = vector.shape_cast %54 : vector<8xf32> to vector<8x1xf32>
    %56 = arith.mulf %53, %53 : vector<8x768xf32>
    %cst_48 = arith.constant dense<0.000000e+00> : vector<8xf32>
    %57 = vector.multi_reduction <add>, %56, %cst_48 [1] : vector<8x768xf32> to vector<8xf32>
    %58 = vector.shape_cast %57 : vector<8xf32> to vector<8x1xf32>
    %cst_49 = arith.constant 0.001953125 : f32
    %59 = vector.broadcast %cst_49 : f32 to vector<8x1xf32>
    %60 = arith.mulf %55, %59 : vector<8x1xf32>
    %cst_50 = arith.constant 0.001953125 : f32
    %61 = vector.broadcast %cst_50 : f32 to vector<8x1xf32>
    %62 = arith.mulf %58, %61 : vector<8x1xf32>
    %63 = arith.mulf %60, %60 : vector<8x1xf32>
    %64 = arith.subf %62, %63 : vector<8x1xf32>
    %cst_51 = arith.constant 0.000000e+00 : f32
    %65 = vector.broadcast %cst_51 : f32 to vector<8x1xf32>
    %66 = arith.maximumf %64, %65 : vector<8x1xf32>
    %cst_52 = arith.constant 9.99999974E-6 : f32
    %67 = vector.broadcast %cst_52 : f32 to vector<8x1xf32>
    %68 = arith.addf %66, %67 : vector<8x1xf32>
    %69 = math.rsqrt %68 : vector<8x1xf32>
    %70 = arith.mulf %69, %48 : vector<8x1xf32>
    %71 = arith.mulf %60, %70 : vector<8x1xf32>
    %72 = arith.subf %49, %71 : vector<8x1xf32>
    %73 = vector.broadcast %70 : vector<8x1xf32> to vector<8x768xf32>
    %74 = arith.mulf %47, %73 : vector<8x768xf32>
    %75 = vector.broadcast %72 : vector<8x1xf32> to vector<8x768xf32>
    %76 = arith.addf %74, %75 : vector<8x768xf32>
    %cst_53 = arith.constant 2.000000e-01 : f32
    %77 = vector.broadcast %cst_53 : f32 to vector<8x768xf32>
    %78 = arith.mulf %77, %76 : vector<8x768xf32>
    %79 = arith.maximumf %76, %78 : vector<8x768xf32>
    %cst_54 = arith.constant 0.000000e+00 : f32
    %80 = vector.shape_cast %2 : vector<1x768xi1> to vector<1x768xi1>
    %81 = vector.broadcast %80 : vector<1x768xi1> to vector<8x768xi1>
    %82 = vector.broadcast %cst_54 : f32 to vector<8x768xf32>
    %83 = arith.select %81, %79, %82 : vector<8x768xi1>, vector<8x768xf32>
    %84 = vector.extract_strided_slice %83 {offsets = [0, 0], sizes = [8, 384], strides = [1, 1]} : vector<8x768xf32> to vector<8x384xf32>
    %c0_55 = arith.constant 0 : index
    %c128 = arith.constant 128 : index
    %85 = vector.load %arg9[%c0_55, %c128] : memref<16x640xf32, #tpu.memory_space<vmem>>, vector<8x384xf32>
    tpu.vector_store %arg9[%c0_55, %c128], %84 {strides = array<i32>} : memref<16x640xf32, #tpu.memory_space<vmem>>, vector<8x384xf32>,
    %86 = vector.extract_strided_slice %83 {offsets = [0, 384], sizes = [8, 384], strides = [1, 1]} : vector<8x768xf32> to vector<8x384xf32>
    %c8_56 = arith.constant 8 : index
    %c128_57 = arith.constant 128 : index
    %87 = vector.load %arg9[%c8_56, %c128_57] : memref<16x640xf32, #tpu.memory_space<vmem>>, vector<8x384xf32>
    tpu.vector_store %arg9[%c8_56, %c128_57], %86 {strides = array<i32>} : memref<16x640xf32, #tpu.memory_space<vmem>>, vector<8x384xf32>,
    %c0_58 = arith.constant 0 : index
    %c0_59 = arith.constant 0 : index
    %88 = vector.load %arg5[%c0_58, %c0_59] : memref<8x72xf32, #tpu.memory_space<vmem>>, vector<8x72xf32>
    %c0_60 = arith.constant 0 : index
    %c0_61 = arith.constant 0 : index
    %89 = vector.load %arg9[%c0_60, %c0_61] : memref<16x640xf32, #tpu.memory_space<vmem>>, vector<8x640xf32>
    %90 = vector.extract_strided_slice %89 {offsets = [0, 109], sizes = [8, 384], strides = [1, 1]} : vector<8x640xf32> to vector<8x384xf32>
    %c0_62 = arith.constant 0 : index
    %c0_63 = arith.constant 0 : index
    %91 = vector.load %arg10[%c0_62, %c0_63] : memref<72x768xf32, #tpu.memory_space<vmem>>, vector<8x384xf32>
    tpu.vector_store %arg10[%c0_62, %c0_63], %90 {strides = array<i32>} : memref<72x768xf32, #tpu.memory_space<vmem>>, vector<8x384xf32>,
    %92 = vector.extract_strided_slice %89 {offsets = [0, 110], sizes = [8, 384], strides = [1, 1]} : vector<8x640xf32> to vector<8x384xf32>
    %c8_64 = arith.constant 8 : index
    %c0_65 = arith.constant 0 : index
    %93 = vector.load %arg10[%c8_64, %c0_65] : memref<72x768xf32, #tpu.memory_space<vmem>>, vector<8x384xf32>
    tpu.vector_store %arg10[%c8_64, %c0_65], %92 {strides = array<i32>} : memref<72x768xf32, #tpu.memory_space<vmem>>, vector<8x384xf32>,
    %94 = vector.extract_strided_slice %89 {offsets = [0, 111], sizes = [8, 384], strides = [1, 1]} : vector<8x640xf32> to vector<8x384xf32>
    %c16_66 = arith.constant 16 : index
    %c0_67 = arith.constant 0 : index
    %95 = vector.load %arg10[%c16_66, %c0_67] : memref<72x768xf32, #tpu.memory_space<vmem>>, vector<8x384xf32>
    tpu.vector_store %arg10[%c16_66, %c0_67], %94 {strides = array<i32>} : memref<72x768xf32, #tpu.memory_space<vmem>>, vector<8x384xf32>,
    %96 = vector.extract_strided_slice %89 {offsets = [0, 127], sizes = [8, 384], strides = [1, 1]} : vector<8x640xf32> to vector<8x384xf32>
    %c24_68 = arith.constant 24 : index
    %c0_69 = arith.constant 0 : index
    %97 = vector.load %arg10[%c24_68, %c0_69] : memref<72x768xf32, #tpu.memory_space<vmem>>, vector<8x384xf32>
    tpu.vector_store %arg10[%c24_68, %c0_69], %96 {strides = array<i32>} : memref<72x768xf32, #tpu.memory_space<vmem>>, vector<8x384xf32>,
    %98 = vector.extract_strided_slice %89 {offsets = [0, 128], sizes = [8, 384], strides = [1, 1]} : vector<8x640xf32> to vector<8x384xf32>
    %c32_70 = arith.constant 32 : index
    %c0_71 = arith.constant 0 : index
    %99 = vector.load %arg10[%c32_70, %c0_71] : memref<72x768xf32, #tpu.memory_space<vmem>>, vector<8x384xf32>
    tpu.vector_store %arg10[%c32_70, %c0_71], %98 {strides = array<i32>} : memref<72x768xf32, #tpu.memory_space<vmem>>, vector<8x384xf32>,
    %100 = vector.extract_strided_slice %89 {offsets = [0, 129], sizes = [8, 384], strides = [1, 1]} : vector<8x640xf32> to vector<8x384xf32>
    %c40_72 = arith.constant 40 : index
    %c0_73 = arith.constant 0 : index
    %101 = vector.load %arg10[%c40_72, %c0_73] : memref<72x768xf32, #tpu.memory_space<vmem>>, vector<8x384xf32>
    tpu.vector_store %arg10[%c40_72, %c0_73], %100 {strides = array<i32>} : memref<72x768xf32, #tpu.memory_space<vmem>>, vector<8x384xf32>,
    %102 = vector.extract_strided_slice %89 {offsets = [0, 145], sizes = [8, 384], strides = [1, 1]} : vector<8x640xf32> to vector<8x384xf32>
    %c48_74 = arith.constant 48 : index
    %c0_75 = arith.constant 0 : index
    %103 = vector.load %arg10[%c48_74, %c0_75] : memref<72x768xf32, #tpu.memory_space<vmem>>, vector<8x384xf32>
    tpu.vector_store %arg10[%c48_74, %c0_75], %102 {strides = array<i32>} : memref<72x768xf32, #tpu.memory_space<vmem>>, vector<8x384xf32>,
    %104 = vector.extract_strided_slice %89 {offsets = [0, 146], sizes = [8, 384], strides = [1, 1]} : vector<8x640xf32> to vector<8x384xf32>
    %c56_76 = arith.constant 56 : index
    %c0_77 = arith.constant 0 : index
    %105 = vector.load %arg10[%c56_76, %c0_77] : memref<72x768xf32, #tpu.memory_space<vmem>>, vector<8x384xf32>
    tpu.vector_store %arg10[%c56_76, %c0_77], %104 {strides = array<i32>} : memref<72x768xf32, #tpu.memory_space<vmem>>, vector<8x384xf32>,
    %106 = vector.extract_strided_slice %89 {offsets = [0, 147], sizes = [8, 384], strides = [1, 1]} : vector<8x640xf32> to vector<8x384xf32>
    %c64_78 = arith.constant 64 : index
    %c0_79 = arith.constant 0 : index
    %107 = vector.load %arg10[%c64_78, %c0_79] : memref<72x768xf32, #tpu.memory_space<vmem>>, vector<8x384xf32>
    tpu.vector_store %arg10[%c64_78, %c0_79], %106 {strides = array<i32>} : memref<72x768xf32, #tpu.memory_space<vmem>>, vector<8x384xf32>,
    %c8_80 = arith.constant 8 : index
    %c0_81 = arith.constant 0 : index
    %108 = vector.load %arg9[%c8_80, %c0_81] : memref<16x640xf32, #tpu.memory_space<vmem>>, vector<8x640xf32>
    %109 = vector.extract_strided_slice %108 {offsets = [0, 109], sizes = [8, 384], strides = [1, 1]} : vector<8x640xf32> to vector<8x384xf32>
    %c0_82 = arith.constant 0 : index
    %c384_83 = arith.constant 384 : index
    %110 = vector.load %arg10[%c0_82, %c384_83] : memref<72x768xf32, #tpu.memory_space<vmem>>, vector<8x384xf32>
    tpu.vector_store %arg10[%c0_82, %c384_83], %109 {strides = array<i32>} : memref<72x768xf32, #tpu.memory_space<vmem>>, vector<8x384xf32>,
    %111 = vector.extract_strided_slice %108 {offsets = [0, 110], sizes = [8, 384], strides = [1, 1]} : vector<8x640xf32> to vector<8x384xf32>
    %c8_84 = arith.constant 8 : index
    %c384_85 = arith.constant 384 : index
    %112 = vector.load %arg10[%c8_84, %c384_85] : memref<72x768xf32, #tpu.memory_space<vmem>>, vector<8x384xf32>
    tpu.vector_store %arg10[%c8_84, %c384_85], %111 {strides = array<i32>} : memref<72x768xf32, #tpu.memory_space<vmem>>, vector<8x384xf32>,
    %113 = vector.extract_strided_slice %108 {offsets = [0, 111], sizes = [8, 384], strides = [1, 1]} : vector<8x640xf32> to vector<8x384xf32>
    %c16_86 = arith.constant 16 : index
    %c384_87 = arith.constant 384 : index
    %114 = vector.load %arg10[%c16_86, %c384_87] : memref<72x768xf32, #tpu.memory_space<vmem>>, vector<8x384xf32>
    tpu.vector_store %arg10[%c16_86, %c384_87], %113 {strides = array<i32>} : memref<72x768xf32, #tpu.memory_space<vmem>>, vector<8x384xf32>,
    %115 = vector.extract_strided_slice %108 {offsets = [0, 127], sizes = [8, 384], strides = [1, 1]} : vector<8x640xf32> to vector<8x384xf32>
    %c24_88 = arith.constant 24 : index
    %c384_89 = arith.constant 384 : index
    %116 = vector.load %arg10[%c24_88, %c384_89] : memref<72x768xf32, #tpu.memory_space<vmem>>, vector<8x384xf32>
    tpu.vector_store %arg10[%c24_88, %c384_89], %115 {strides = array<i32>} : memref<72x768xf32, #tpu.memory_space<vmem>>, vector<8x384xf32>,
    %117 = vector.extract_strided_slice %108 {offsets = [0, 128], sizes = [8, 384], strides = [1, 1]} : vector<8x640xf32> to vector<8x384xf32>
    %c32_90 = arith.constant 32 : index
    %c384_91 = arith.constant 384 : index
    %118 = vector.load %arg10[%c32_90, %c384_91] : memref<72x768xf32, #tpu.memory_space<vmem>>, vector<8x384xf32>
    tpu.vector_store %arg10[%c32_90, %c384_91], %117 {strides = array<i32>} : memref<72x768xf32, #tpu.memory_space<vmem>>, vector<8x384xf32>,
    %119 = vector.extract_strided_slice %108 {offsets = [0, 129], sizes = [8, 384], strides = [1, 1]} : vector<8x640xf32> to vector<8x384xf32>
    %c40_92 = arith.constant 40 : index
    %c384_93 = arith.constant 384 : index
    %120 = vector.load %arg10[%c40_92, %c384_93] : memref<72x768xf32, #tpu.memory_space<vmem>>, vector<8x384xf32>
    tpu.vector_store %arg10[%c40_92, %c384_93], %119 {strides = array<i32>} : memref<72x768xf32, #tpu.memory_space<vmem>>, vector<8x384xf32>,
    %121 = vector.extract_strided_slice %108 {offsets = [0, 145], sizes = [8, 384], strides = [1, 1]} : vector<8x640xf32> to vector<8x384xf32>
    %c48_94 = arith.constant 48 : index
    %c384_95 = arith.constant 384 : index
    %122 = vector.load %arg10[%c48_94, %c384_95] : memref<72x768xf32, #tpu.memory_space<vmem>>, vector<8x384xf32>
    tpu.vector_store %arg10[%c48_94, %c384_95], %121 {strides = array<i32>} : memref<72x768xf32, #tpu.memory_space<vmem>>, vector<8x384xf32>,
    %123 = vector.extract_strided_slice %108 {offsets = [0, 146], sizes = [8, 384], strides = [1, 1]} : vector<8x640xf32> to vector<8x384xf32>
    %c56_96 = arith.constant 56 : index
    %c384_97 = arith.constant 384 : index
    %124 = vector.load %arg10[%c56_96, %c384_97] : memref<72x768xf32, #tpu.memory_space<vmem>>, vector<8x384xf32>
    tpu.vector_store %arg10[%c56_96, %c384_97], %123 {strides = array<i32>} : memref<72x768xf32, #tpu.memory_space<vmem>>, vector<8x384xf32>,
    %125 = vector.extract_strided_slice %108 {offsets = [0, 147], sizes = [8, 384], strides = [1, 1]} : vector<8x640xf32> to vector<8x384xf32>
    %c64_98 = arith.constant 64 : index
    %c384_99 = arith.constant 384 : index
    %126 = vector.load %arg10[%c64_98, %c384_99] : memref<72x768xf32, #tpu.memory_space<vmem>>, vector<8x384xf32>
    tpu.vector_store %arg10[%c64_98, %c384_99], %125 {strides = array<i32>} : memref<72x768xf32, #tpu.memory_space<vmem>>, vector<8x384xf32>,
    %c0_100 = arith.constant 0 : index
    %c0_101 = arith.constant 0 : index
    %127 = vector.load %arg10[%c0_100, %c0_101] : memref<72x768xf32, #tpu.memory_space<vmem>>, vector<72x768xf32>
    %cst_102 = arith.constant dense<0.000000e+00> : vector<8x768xf32>
    %128 = tpu.matmul %88, %127, %cst_102 {dimension_numbers = #tpu.dot_dimension_numbers<[1], [0], [0], [1], [0, 0, 1, 1], [], []>} : vector<8x72xf32>, vector<72x768xf32>, vector<8x768xf32> -> vector<8x768xf32>
    %c0_103 = arith.constant 0 : index
    %c0_104 = arith.constant 0 : index
    %129 = vector.load %arg6[%c0_103, %c0_104] : memref<8x1xf32, #tpu.memory_space<vmem>>, vector<8x1xf32>
    %c0_105 = arith.constant 0 : index
    %c0_106 = arith.constant 0 : index
    %130 = vector.load %arg7[%c0_105, %c0_106] : memref<8x1xf32, #tpu.memory_space<vmem>>, vector<8x1xf32>
    %cst_107 = arith.constant 0.000000e+00 : f32
    %131 = vector.shape_cast %2 : vector<1x768xi1> to vector<1x768xi1>
    %132 = vector.broadcast %131 : vector<1x768xi1> to vector<8x768xi1>
    %133 = vector.broadcast %cst_107 : f32 to vector<8x768xf32>
    %134 = arith.select %132, %128, %133 : vector<8x768xi1>, vector<8x768xf32>
    %cst_108 = arith.constant dense<0.000000e+00> : vector<8xf32>
    %135 = vector.multi_reduction <add>, %134, %cst_108 [1] : vector<8x768xf32> to vector<8xf32>
    %136 = vector.shape_cast %135 : vector<8xf32> to vector<8x1xf32>
    %137 = arith.mulf %134, %134 : vector<8x768xf32>
    %cst_109 = arith.constant dense<0.000000e+00> : vector<8xf32>
    %138 = vector.multi_reduction <add>, %137, %cst_109 [1] : vector<8x768xf32> to vector<8xf32>
    %139 = vector.shape_cast %138 : vector<8xf32> to vector<8x1xf32>
    %cst_110 = arith.constant 0.001953125 : f32
    %140 = vector.broadcast %cst_110 : f32 to vector<8x1xf32>
    %141 = arith.mulf %136, %140 : vector<8x1xf32>
    %cst_111 = arith.constant 0.001953125 : f32
    %142 = vector.broadcast %cst_111 : f32 to vector<8x1xf32>
    %143 = arith.mulf %139, %142 : vector<8x1xf32>
    %144 = arith.mulf %141, %141 : vector<8x1xf32>
    %145 = arith.subf %143, %144 : vector<8x1xf32>
    %cst_112 = arith.constant 0.000000e+00 : f32
    %146 = vector.broadcast %cst_112 : f32 to vector<8x1xf32>
    %147 = arith.maximumf %145, %146 : vector<8x1xf32>
    %cst_113 = arith.constant 9.99999974E-6 : f32
    %148 = vector.broadcast %cst_113 : f32 to vector<8x1xf32>
    %149 = arith.addf %147, %148 : vector<8x1xf32>
    %150 = math.rsqrt %149 : vector<8x1xf32>
    %151 = arith.mulf %150, %129 : vector<8x1xf32>
    %152 = arith.mulf %141, %151 : vector<8x1xf32>
    %153 = arith.subf %130, %152 : vector<8x1xf32>
    %154 = vector.broadcast %151 : vector<8x1xf32> to vector<8x768xf32>
    %155 = arith.mulf %128, %154 : vector<8x768xf32>
    %156 = vector.broadcast %153 : vector<8x1xf32> to vector<8x768xf32>
    %157 = arith.addf %155, %156 : vector<8x768xf32>
    %c0_114 = arith.constant 0 : index
    %c128_115 = arith.constant 128 : index
    %158 = vector.load %arg0[%c0_114, %c128_115] : memref<16x640xf32, #tpu.memory_space<vmem>>, vector<8x384xf32>
    %159 = vector.extract_strided_slice %157 {offsets = [0, 0], sizes = [8, 384], strides = [1, 1]} : vector<8x768xf32> to vector<8x384xf32>
    %160 = arith.addf %159, %158 : vector<8x384xf32>
    %c0_116 = arith.constant 0 : index
    %c0_117 = arith.constant 0 : index
    %161 = vector.load %arg8[%c0_116, %c0_117] : memref<16x384xf32, #tpu.memory_space<vmem>>, vector<8x384xf32>
    tpu.vector_store %arg8[%c0_116, %c0_117], %160 {strides = array<i32>} : memref<16x384xf32, #tpu.memory_space<vmem>>, vector<8x384xf32>,
    %c8_118 = arith.constant 8 : index
    %c128_119 = arith.constant 128 : index
    %162 = vector.load %arg0[%c8_118, %c128_119] : memref<16x640xf32, #tpu.memory_space<vmem>>, vector<8x384xf32>
    %163 = vector.extract_strided_slice %157 {offsets = [0, 384], sizes = [8, 384], strides = [1, 1]} : vector<8x768xf32> to vector<8x384xf32>
    %164 = arith.addf %163, %162 : vector<8x384xf32>
    %c8_120 = arith.constant 8 : index
    %c0_121 = arith.constant 0 : index
    %165 = vector.load %arg8[%c8_120, %c0_121] : memref<16x384xf32, #tpu.memory_space<vmem>>, vector<8x384xf32>
    tpu.vector_store %arg8[%c8_120, %c0_121], %164 {strides = array<i32>} : memref<16x384xf32, #tpu.memory_space<vmem>>, vector<8x384xf32>,
    return
  }
}

</mosaic_0001>

<bundles_post_ra>
// kernel: resnet_block.1
= control target key start
LH: loop header
LB: loop body
LE: loop exit
PB: predicated region body
PF: predicated region fallthrough
CT: control target
= control target key end

     0   :  { %s1790_s13 = smov 19   ;;  %s1791_s14 = smov 18   ;;  %v1798_v14 = vmov 0.0   ;;  %vm53_vm0 = vcmask 154624   ;;  %vm71_vm1 = vcmask 146432   ;;  %vm89_vm2 = vcmask 138240   ;;  %s2476_s0 = inlined_call_operand.vmem [shape: f32[16,640], index: 0, kind: input, shape index: {}]   ;;  %s2477_s2 = inlined_call_operand.vmem [shape: f32[8,72], index: 2, kind: input, shape index: {}]   ;;  %s2478_s1 = inlined_call_operand.vmem [shape: f32[1,768], index: 1, kind: input, shape index: {}]   ;;  %s2479_s3 = inlined_call_operand.vmem [shape: f32[8,1], index: 3, kind: input, shape index: {}]   ;;  %s2480_s4 = inlined_call_operand.vmem [shape: f32[8,1], index: 4, kind: input, shape index: {}]   ;;  %s2481_s5 = inlined_call_operand.vmem [shape: f32[8,72], index: 5, kind: input, shape index: {}]   ;;  %s2482_s6 = inlined_call_operand.vmem [shape: f32[8,1], index: 6, kind: input, shape index: {}]   ;;  %s2483_s7 = inlined_call_operand.vmem [shape: f32[8,1], index: 7, kind: input, shape index: {}]   ;;  %s2484_s8 = inlined_call_operand.vmem [shape: f32[16,384], index: 8, kind: output, shape index: {}]  }
   0x1   :  { %v1849_v0 = vld [vmem:[%s2476_s0 + $0x8] sm:$0xff]  ;;  %v1854_v1 = vld [vmem:[%s2476_s0 + $0x10] sm:$0xff]  ;;  %v36_v2 = vld [vmem:[%s2476_s0] sm:$0xff]  ;;  %s1792_s15 = smov 17   ;;  %s1793_s16 = smov 1   ;;  %464 = vmatprep.mubr.f32.mxu0 %v1798_v14  ;;  %535 = vmatprep.mubr.f32.mxu1 %v1798_v14  ;;  %vm107_vm3 = vcmask 7168  }
   0x2   :  { %v1504_v3 = vpack.i.bf16 %v1854_v1, %v1849_v0  ;;  %v193_v4 = vld [vmem:[%s2476_s0 + $0x28] sm:$0xff]  ;;  %v1873_v6 = vld [vmem:[%s2476_s0 + $0x18] sm:$0xff]  ;;  %v1878_v7 = vld [vmem:[%s2476_s0 + $0x30] sm:$0xff]  ;;  %s1794_s21 = smov 127   ;;  %s1795_s22 = smov 111   ;;  %vm129_vm4 = vcmask 1039360  }
   0x3   :  { %v1514_v5 = vpack.i.bf16 %v193_v4, %v36_v2  ;;  %v1544_v8 = vpack.i.bf16 %v1873_v6, %v1854_v1  ;;  %v1549_v9 = vpack.i.bf16 %v1878_v7, %v1849_v0  ;;  %s1796_s23 = smov 110   ;;  %v1574_v10 = vpack.i.bf16 %v1873_v6, %v1878_v7  ;;  %v1899_v11 = vld [vmem:[%s2476_s0 + $0x38] sm:$0xff]  ;;  %v1904_v12 = vld [vmem:[%s2476_s0 + $0x40] sm:$0xff]  ;;  %s1797_s28 = smov 109   ;;  %v197_v17 = vld [vmem:[%s2476_s0 + $0x48] sm:$0xff] }
   0x4   :  { %1505 = vrot.lane.b32.xlu0 %v1504_v3, %s1790_s13  ;;  %v1584_v13 = vpack.i.bf16 %v1904_v12, %v1899_v11  ;;  %v40_v15 = vld [vmem:[%s2476_s0 + $0x20] sm:$0xff]  ;;  %v1619_v18 = vpack.i.bf16 %v197_v17, %v1904_v12  ;;  %vm147_vm5 = vcmask 908288   ;;  %vm165_vm6 = vcmask 900096  }
   0x5   :  { %1515 = vrot.lane.b32.xlu1 %v1514_v5, %s1790_s13  ;;  %v1614_v16 = vpack.i.bf16 %v40_v15, %v1899_v11  ;;  %vm183_vm7 = vcmask 891904   ;;  %vm396_vm8 = vcmask 588800  }
   0x8   :  { %1510 = vrot.lane.b32.xlu0 %v1504_v3, %s1791_s14 }
   0x9   :  { %1520 = vrot.lane.b32.xlu1 %v1514_v5, %s1791_s14 }
   0xc   :  { %1525 = vrot.lane.b32.xlu0 %v1504_v3, %s1792_s15 }
   0xd   :  { %1530 = vrot.lane.b32.xlu1 %v1504_v3, %s1793_s16 }
  0x10   :  { %1535 = vrot.lane.b32.xlu0 %v1514_v5, %s1792_s15 }
  0x11   :  { %1540 = vrot.lane.b32.xlu1 %v1514_v5, %s1793_s16 }
  0x14   :  { %1545 = vrot.lane.b32.xlu0 %v1544_v8, %s1794_s21 }
  0x15   :  { %1550 = vrot.lane.b32.xlu1 %v1549_v9, %s1794_s21 }
  0x18   :  { %1555 = vrot.lane.b32.xlu0 %v1544_v8, %s1795_s22 }
  0x19   :  { %1560 = vrot.lane.b32.xlu1 %v1544_v8, %s1796_s23 }
  0x1c   :  { %1565 = vrot.lane.b32.xlu0 %v1549_v9, %s1795_s22 }
  0x1d   :  { %1570 = vrot.lane.b32.xlu1 %v1549_v9, %s1796_s23 }
  0x20   :  { %1575 = vrot.lane.b32.xlu0 %v1574_v10, %s1790_s13 }
  0x21   :  { %1580 = vrot.lane.b32.xlu1 %v1574_v10, %s1791_s14 }
  0x24   :  { %177 = vrot.lane.b32.xlu0 %v1854_v1, %s1797_s28 }
  0x25   :  { %179 = vrot.lane.b32.xlu1 %v1873_v6, %s1797_s28 }
  0x28   :  { %1585 = vrot.lane.b32.xlu0 %v1584_v13, %s1790_s13 }
  0x29   :  { %1590 = vrot.lane.b32.xlu1 %v1584_v13, %s1791_s14 }
  0x2c   :  { %1595 = vrot.lane.b32.xlu0 %v1574_v10, %s1792_s15 }
  0x2d   :  { %1600 = vrot.lane.b32.xlu1 %v1574_v10, %s1793_s16 }
  0x30   :  { %175 = vrot.lane.b32.xlu0 %v1849_v0, %s1797_s28 }
  0x31   :  { %1605 = vrot.lane.b32.xlu1 %v1584_v13, %s1792_s15 }
  0x34   :  { %1610 = vrot.lane.b32.xlu0 %v1584_v13, %s1793_s16 }
  0x35   :  { %1615 = vrot.lane.b32.xlu1 %v1614_v16, %s1794_s21 }
  0x38   :  { %1620 = vrot.lane.b32.xlu0 %v1619_v18, %s1794_s21 }
  0x39   :  { %1625 = vrot.lane.b32.xlu1 %v1614_v16, %s1795_s22 }
  0x3c   :  { %1630 = vrot.lane.b32.xlu0 %v1614_v16, %s1796_s23 }
  0x3d   :  { %1635 = vrot.lane.b32.xlu1 %v1619_v18, %s1795_s22 }
  0x40   :  { %1640 = vrot.lane.b32.xlu0 %v1619_v18, %s1796_s23 }
  0x41   :  { %325 = vrot.lane.b32.xlu1 %v1878_v7, %s1797_s28 }
  0x44   :  { %327 = vrot.lane.b32.xlu0 %v1899_v11, %s1797_s28 }
  0x45   :  { %181 = vrot.lane.b32.xlu1 %v40_v15, %s1797_s28 }
  0x48   :  { %329 = vrot.lane.b32.xlu0 %v1904_v12, %s1797_s28 }
  0x49   :  { %331 = vrot.lane.b32.xlu1 %v197_v17, %s1797_s28 }
  0x76   :  { %v1944_v19 = vpop.permute.xlu0 %1505 }
  0x77   :  { %v1946_v20 = vpop.permute.xlu1 %1515  ;;  %v1508_v21 = vunpack.i.h.bf16 %v1944_v19  ;;  %v1507_v22 = vunpack.i.l.bf16 %v1944_v19 }
  0x78   :  { %v1517_v23 = vunpack.i.l.bf16 %v1946_v20  ;;  %v1518_v17 = vunpack.i.h.bf16 %v1946_v20 }
  0x79   :  { %v55_v29 = vsel %vm53_vm0, %v1507_v22, %v1508_v21 }
  0x7a   :  { %v1951_v24 = vpop.permute.xlu0 %1510  ;;  %v54_v33 = vsel %vm53_vm0, %v1517_v23, %v1507_v22 }
  0x7b   :  { %v1513_v25 = vunpack.i.h.bf16 %v1951_v24  ;;  %v1512_v26 = vunpack.i.l.bf16 %v1951_v24  ;;  %v1955_v27 = vpop.permute.xlu1 %1520 }
  0x7c   :  { %v1522_v28 = vunpack.i.l.bf16 %v1955_v27 }
  0x7d   :  { %v73_v30 = vsel %vm71_vm1, %v1512_v26, %v1513_v25 }
  0x7e   :  { %v1964_v31 = vpop.permute.xlu0 %1525  ;;  %v1391_v32 = vpack.c.bf16 %v73_v30, %v55_v29  ;;  %v72_v34 = vsel %vm71_vm1, %v1522_v28, %v1512_v26  ;;  %v1523_v28 = vunpack.i.h.bf16 %v1955_v27 }
  0x7f   :  { %v1528_v35 = vunpack.i.h.bf16 %v1964_v31  ;;  %v1527_v36 = vunpack.i.l.bf16 %v1964_v31  ;;  %v1970_v37 = vpop.permute.xlu1 %1530  ;;  %v1393_v38 = vpack.c.bf16 %v72_v34, %v54_v33 }
  0x80   :  { %v1533_v39 = vunpack.i.h.bf16 %v1970_v37  ;;  %v1532_v40 = vunpack.i.l.bf16 %v1970_v37  ;;  %1392 = vmatprep.subr.bf16.mxu0 %v1391_v32 }
  0x81   :  { %1394 = vmatpush1.bf16.msra.mxu0 %v1393_v38  ;;  %v91_v41 = vsel %vm89_vm2, %v1527_v36, %v1528_v35 }
  0x82   :  { %v1977_v42 = vpop.permute.xlu0 %1535  ;;  %v109_v43 = vsel %vm107_vm3, %v1532_v40, %v1533_v39 }
  0x83   :  { %v1537_v44 = vunpack.i.l.bf16 %v1977_v42  ;;  %v1983_v45 = vpop.permute.xlu1 %1540  ;;  %v1395_v46 = vpack.c.bf16 %v109_v43, %v91_v41  ;;  %v1538_v24 = vunpack.i.h.bf16 %v1977_v42 }
  0x84   :  { %v1542_v47 = vunpack.i.l.bf16 %v1983_v45 }
  0x85   :  { %1396 = vmatprep.subr.bf16.mxu0 %v1395_v46  ;;  %v90_v48 = vsel %vm89_vm2, %v1537_v44, %v1527_v36 }
  0x86   :  { %v1987_v49 = vpop.permute.xlu0 %1545  ;;  %v108_v50 = vsel %vm107_vm3, %v1542_v47, %v1532_v40 }
  0x87   :  { %v1548_v51 = vunpack.i.h.bf16 %v1987_v49  ;;  %v1547_v52 = vunpack.i.l.bf16 %v1987_v49  ;;  %v1992_v53 = vpop.permute.xlu1 %1550  ;;  %v1397_v54 = vpack.c.bf16 %v108_v50, %v90_v48 }
  0x88   :  { %v1552_v55 = vunpack.i.l.bf16 %v1992_v53 }
  0x89   :  { %1398 = vmatpush1.bf16.msra.mxu0 %v1397_v54  ;;  %v131_v56 = vsel %vm129_vm4, %v1547_v52, %v1548_v51 }
  0x8a   :  { %v1998_v57 = vpop.permute.xlu0 %1555  ;;  %v1399_v58 = vpack.c.bf16 %v131_v56, %v1854_v1  ;;  %v130_v59 = vsel %vm129_vm4, %v1552_v55, %v1547_v52 }
  0x8b   :  { %v1558_v60 = vunpack.i.h.bf16 %v1998_v57  ;;  %v1557_v61 = vunpack.i.l.bf16 %v1998_v57  ;;  %v2004_v62 = vpop.permute.xlu1 %1560  ;;  %v1401_v63 = vpack.c.bf16 %v130_v59, %v1849_v0 }
  0x8c   :  { %v1563_v2 = vunpack.i.h.bf16 %v2004_v62  ;;  %v1562_v3 = vunpack.i.l.bf16 %v2004_v62  ;;  %1400 = vmatprep.subr.bf16.mxu0 %v1399_v58 }
  0x8d   :  { %1402 = vmatpush1.bf16.msra.mxu0 %v1401_v63  ;;  %v149_v1 = vsel %vm147_vm5, %v1557_v61, %v1558_v60 }
  0x8e   :  { %v2012_v4 = vpop.permute.xlu0 %1565  ;;  %v167_v5 = vsel %vm165_vm6, %v1562_v3, %v1563_v2 }
  0x8f   :  { %v1567_v8 = vunpack.i.l.bf16 %v2012_v4  ;;  %v2018_v0 = vpop.permute.xlu1 %1570  ;;  %v1403_v9 = vpack.c.bf16 %v167_v5, %v149_v1  ;;  %v1568_v49 = vunpack.i.h.bf16 %v2012_v4 }
  0x90   :  { %v1572_v10 = vunpack.i.l.bf16 %v2018_v0 }
  0x91   :  { %1404 = vmatprep.subr.bf16.mxu0 %v1403_v9  ;;  %v148_v13 = vsel %vm147_vm5, %v1567_v8, %v1557_v61 }
  0x92   :  { %v1576_v15 = vpop.permute.xlu0 %1575  ;;  %v166_v16 = vsel %vm165_vm6, %v1572_v10, %v1562_v3 }
  0x93   :  { %v1578_v18 = vunpack.i.h.bf16 %v1576_v15  ;;  %v1577_v22 = vunpack.i.l.bf16 %v1576_v15  ;;  %v1581_v23 = vpop.permute.xlu1 %1580  ;;  %v1405_v26 = vpack.c.bf16 %v166_v16, %v148_v13 }
  0x94   :  { %v1583_v29 = vunpack.i.h.bf16 %v1581_v23  ;;  %v1582_v30 = vunpack.i.l.bf16 %v1581_v23  ;;  %v1553_v23 = vunpack.i.h.bf16 %v1992_v53 }
  0x95   :  { %1406 = vmatpush1.bf16.msra.mxu0 %v1405_v26  ;;  %v210_v32 = vsel %vm53_vm0, %v1518_v17, %v1577_v22  ;;  %v56_v33 = vsel %vm53_vm0, %v1508_v21, %v1578_v18 }
  0x96   :  { %v178_v34 = vpop.permute.xlu0 %177  ;;  %v227_v36 = vsel %vm71_vm1, %v1523_v28, %v1582_v30  ;;  %v74_v20 = vsel %vm71_vm1, %v1513_v25, %v1583_v29  ;;  %v1543_v25 = vunpack.i.h.bf16 %v1983_v45 }
  0x97   :  { %v2033_v38 = vpop.permute.xlu1 %179  ;;  %v1407_v27 = vpack.c.bf16 %v227_v36, %v210_v32  ;;  %v1409_v40 = vpack.c.bf16 %v74_v20, %v56_v33 }
  0x98   :  { %v185_v41 = vsel %vm183_vm7, %v178_v34, %v2033_v38 }
  0x99   :  { %416 = vmatprep.subr.mxu0 %v185_v41  ;;  %1408 = vmatprep.subr.bf16.mxu1 %v1407_v27 }
  0x9a   :  { %1410 = vmatpush1.bf16.msra.mxu1 %v1409_v40  ;;  %v1586_v19 = vpop.permute.xlu0 %1585 }
  0x9b   :  { %v1591_v43 = vpop.permute.xlu1 %1590  ;;  %v1588_v21 = vunpack.i.h.bf16 %v1586_v19  ;;  %v1587_v44 = vunpack.i.l.bf16 %v1586_v19 }
  0x9c   :  { %v1593_v46 = vunpack.i.h.bf16 %v1591_v43  ;;  %v1592_v47 = vunpack.i.l.bf16 %v1591_v43 }
  0x9d   :  { %v212_v58 = vsel %vm53_vm0, %v1587_v44, %v1588_v21  ;;  %v211_v42 = vsel %vm53_vm0, %v1577_v22, %v1587_v44 }
  0x9e   :  { %v1596_v48 = vpop.permute.xlu0 %1595  ;;  %v229_v59 = vsel %vm71_vm1, %v1592_v47, %v1593_v46  ;;  %v228_v45 = vsel %vm71_vm1, %v1582_v30, %v1592_v47 }
  0x9f   :  { %v1598_v50 = vunpack.i.h.bf16 %v1596_v48  ;;  %v1597_v52 = vunpack.i.l.bf16 %v1596_v48  ;;  %v1601_v54 = vpop.permute.xlu1 %1600  ;;  %v1423_v31 = vpack.c.bf16 %v229_v59, %v212_v58  ;;  %v1425_v15 = vpack.c.bf16 %v228_v45, %v211_v42 }
  0xa0   :  { %v1603_v55 = vunpack.i.h.bf16 %v1601_v54  ;;  %v1602_v56 = vunpack.i.l.bf16 %v1601_v54 }
  0xa1   :  { %v244_v61 = vsel %vm89_vm2, %v1538_v24, %v1597_v52  ;;  %v92_v63 = vsel %vm89_vm2, %v1528_v35, %v1598_v50  ;;  %v2055_v35 = vld [vmem:[%s2477_s2] sm:$0xff] }
  0xa2   :  { %v176_v3 = vpop.permute.xlu0 %175  ;;  %v261_v1 = vsel %vm107_vm3, %v1543_v25, %v1602_v56  ;;  %v110_v5 = vsel %vm107_vm3, %v1533_v39, %v1603_v55 }
  0xa3   :  { %v1606_v8 = vpop.permute.xlu1 %1605  ;;  %v184_v9 = vsel %vm183_vm7, %v176_v3, %v178_v34  ;;  %v1411_v10 = vpack.c.bf16 %v261_v1, %v244_v61  ;;  %v1413_v13 = vpack.c.bf16 %v110_v5, %v92_v63 }
  0xa4   :  { %417 = vmatpush1.msra.mxu0 %v184_v9  ;;  %v1608_v16 = vunpack.i.h.bf16 %v1606_v8  ;;  %v1607_v17 = vunpack.i.l.bf16 %v1606_v8 }
  0xa5   :  { %1412 = vmatprep.subr.bf16.mxu1 %v1411_v10  ;;  %1424 = vmatprep.subr.bf16.mxu0 %v1423_v31 }
  0xa6   :  { %1414 = vmatpush1.bf16.msra.mxu1 %v1413_v13  ;;  %v1611_v37 = vpop.permute.xlu0 %1610  ;;  %1379 = vmatmul.mubr.msk.f32.vlgmr.msra.gmra.mrb[0].mxu0 %vm396_vm8, %v2055_v35  ;;  %v245_v29 = vsel %vm89_vm2, %v1597_v52, %v1607_v17  ;;  %v246_v32 = vsel %vm89_vm2, %v1607_v17, %v1608_v16  ;;  %v616_v16 = vlaneseq  ;;  %v29_v17 = vld [vmem:[%s2478_s1] sm:$0x3f] }
  0xa7   :  { %v1613_v39 = vunpack.i.h.bf16 %v1611_v37  ;;  %v1612_v18 = vunpack.i.l.bf16 %v1611_v37  ;;  %v1616_v22 = vpop.permute.xlu1 %1615  ;;  %1426 = vmatpush1.bf16.msra.mxu0 %v1425_v15  ;;  %606 = vmatprep.mubr.f32.mxu0 %v1798_v14  ;;  %vm30_vm9 = vcmp.ne.f32.partialorder %v29_v17, 0.0 }
  0xa8   :  { %v1618_v26 = vunpack.i.h.bf16 %v1616_v22  ;;  %v1617_v28 = vunpack.i.l.bf16 %v1616_v22  ;;  %v617_v37 = vshrl.u32 %v616_v16, 7 }
  0xa9   :  { %v262_v30 = vsel %vm107_vm3, %v1602_v56, %v1612_v18  ;;  %v263_v33 = vsel %vm107_vm3, %v1612_v18, %v1613_v39 }
  0xaa   :  { %v1429_v34 = vpack.c.bf16 %v262_v30, %v245_v29  ;;  %v1621_v36 = vpop.permute.xlu0 %1620  ;;  %v282_v20 = vsel %vm129_vm4, %v1553_v23, %v1617_v28  ;;  %v1427_v27 = vpack.c.bf16 %v263_v33, %v246_v32  ;;  %v132_v40 = vsel %vm129_vm4, %v1548_v51, %v1618_v26 }
  0xab   :  { %v1623_v53 = vunpack.i.h.bf16 %v1621_v36  ;;  %v1622_v41 = vunpack.i.l.bf16 %v1621_v36  ;;  %v1626_v19 = vpop.permute.xlu1 %1625  ;;  %v1415_v43 = vpack.c.bf16 %v282_v20, %v1878_v7  ;;  %v1417_v21 = vpack.c.bf16 %v132_v40, %v1873_v6 }
  0xac   :  { %v1628_v44 = vunpack.i.h.bf16 %v1626_v19  ;;  %v1627_v46 = vunpack.i.l.bf16 %v1626_v19  ;;  %1428 = vmatprep.subr.bf16.mxu0 %v1427_v27  ;;  %v1573_v7 = vunpack.i.h.bf16 %v2018_v0  ;;  %v618_v39 = vsub.s32 0, %v617_v37 }
  0xad   :  { %v283_v47 = vsel %vm129_vm4, %v1617_v28, %v1622_v41  ;;  %1416 = vmatprep.subr.bf16.mxu1 %v1415_v43  ;;  %1430 = vmatpush1.bf16.msra.mxu0 %v1429_v34  ;;  %v284_v48 = vsel %vm129_vm4, %v1622_v41, %v1623_v53  ;;  %v622_v22 = vsub.s32 1, %v617_v37  ;;  %v626_v20 = vsub.s32 2, %v617_v37 }
  0xae   :  { %v1433_v51 = vpack.c.bf16 %v283_v47, %v1899_v11  ;;  %1418 = vmatpush1.bf16.msra.mxu1 %v1417_v21  ;;  %v1631_v24 = vpop.permute.xlu0 %1630  ;;  %v1431_v25 = vpack.c.bf16 %v284_v48, %v1904_v12  ;;  %v299_v54 = vsel %vm147_vm5, %v1568_v49, %v1627_v46  ;;  %v150_v55 = vsel %vm147_vm5, %v1558_v60, %v1628_v44 }
  0xaf   :  { %v1633_v6 = vunpack.i.h.bf16 %v1631_v24  ;;  %v1632_v50 = vunpack.i.l.bf16 %v1631_v24  ;;  %v1636_v52 = vpop.permute.xlu1 %1635  ;;  %v630_v27 = vsub.s32 3, %v617_v37  ;;  %v634_v41 = vsub.s32 4, %v617_v37 }
  0xb0   :  { %1432 = vmatprep.subr.bf16.mxu0 %v1431_v25  ;;  %v1638_v56 = vunpack.i.h.bf16 %v1636_v52  ;;  %v1637_v4 = vunpack.i.l.bf16 %v1636_v52  ;;  %v638_v19 = vsub.s32 5, %v617_v37 }
  0xb1   :  { %1434 = vmatpush1.bf16.msra.mxu0 %v1433_v51  ;;  %v316_v11 = vsel %vm165_vm6, %v1573_v7, %v1632_v50  ;;  %v168_v12 = vsel %vm165_vm6, %v1563_v2, %v1633_v6 }
  0xb2   :  { %v1641_v0 = vpop.permute.xlu0 %1640  ;;  %v1419_v58 = vpack.c.bf16 %v316_v11, %v299_v54  ;;  %v1421_v59 = vpack.c.bf16 %v168_v12, %v150_v55  ;;  %v300_v57 = vsel %vm147_vm5, %v1627_v46, %v1637_v4  ;;  %v301_v45 = vsel %vm147_vm5, %v1637_v4, %v1638_v56 }
  0xb3   :  { %v1643_v61 = vunpack.i.h.bf16 %v1641_v0  ;;  %v1642_v63 = vunpack.i.l.bf16 %v1641_v0  ;;  %v326_v42 = vpop.permute.xlu1 %325 }
  0xb4   :  { %1420 = vmatprep.subr.bf16.mxu1 %v1419_v58 }
  0xb5   :  { %v317_v60 = vsel %vm165_vm6, %v1632_v50, %v1642_v63  ;;  %1422 = vmatpush1.bf16.msra.mxu1 %v1421_v59  ;;  %v318_v3 = vsel %vm165_vm6, %v1642_v63, %v1643_v61 }
  0xb6   :  { %v1437_v1 = vpack.c.bf16 %v317_v60, %v300_v57  ;;  %v328_v62 = vpop.permute.xlu0 %327  ;;  %v1435_v5 = vpack.c.bf16 %v318_v3, %v301_v45 }
  0xb7   :  { %v182_v2 = vpop.permute.xlu1 %181  ;;  %v333_v8 = vsel %vm183_vm7, %v326_v42, %v328_v62 }
  0xb8   :  { %487 = vmatprep.subr.mxu1 %v333_v8  ;;  %1436 = vmatprep.subr.bf16.mxu0 %v1435_v5  ;;  %v186_v9 = vsel %vm183_vm7, %v2033_v38, %v182_v2  ;;  %v1799_v38 = vmov 0   ;;  %v614_v2 = vld [vmem:[%s2480_s4] sm:$0xff] }
  0xb9   :  { %488 = vmatpush1.msra.mxu1 %v186_v9  ;;  %1438 = vmatpush1.bf16.msra.mxu0 %v1437_v1  ;;  %v615_v18 = vsel %vm30_vm9, 1, %v1799_v38  ;;  %v613_v1 = vld [vmem:[%s2479_s3] sm:$0xff]  ;;  %vm1800_vm9 = vmmov 1  }
  0xba   :  { %v330_v10 = vpop.permute.xlu0 %329  ;;  %1380 = vmatmul.mubr.msk.f32.vlgmr.msra.gmra.mrb[0].mxu1 %vm396_vm8, %v2055_v35  ;;  %1644 = vset.pattern.permute.xlu0 %v1799_v38  ;;  %v2103_v23 = vrot.slane %v615_v18, %v618_v39  ;;  %v2105_v26 = vrot.slane %v615_v18, %v622_v22  ;;  %v2119_v40 = vrot.slane %v615_v18, %v626_v20 }
  0xbb   :  { %v334_v13 = vsel %vm183_vm7, %v328_v62, %v330_v10  ;;  %v332_v31 = vpop.permute.xlu1 %331  ;;  %1148 = vmatprep.mubr.f32.mxu1 %v1798_v14  ;;  %1645 = vset.pattern.permute.xlu1 %v1799_v38  ;;  %v2121_v53 = vrot.slane %v615_v18, %v630_v27  ;;  %v2125_v43 = vrot.slane %v615_v18, %v634_v41 }
  0xbc   :  { %v335_v15 = vsel %vm183_vm7, %v330_v10, %v332_v31  ;;  %vm640_vm10 = vcmp.eq.s32.totalorder %v2103_v23, 1  ;;  %vm2486_vm11 = vcmp.eq.s32.totalorder %v2105_v26, 1  ;;  %vm642_vm12 = vcmp.eq.s32.totalorder %v2119_v40, 1 }
  0xbd   :  { %558 = vmatprep.subr.mxu0 %v335_v15  ;;  %vm643_vm13 = vcmp.eq.s32.totalorder %v2121_v53, 1  ;;  %v2127_v44 = vrot.slane %v615_v18, %v638_v19  ;;  %vm2485_vm14 = vcmp.eq.s32.totalorder %v2125_v43, 1 }
  0xbe   :  { %559 = vmatpush1.msra.mxu0 %v334_v13 }
  0xbf   :  { %1381 = vmatmul.mubr.msk.f32.vlgmr.msra.gmra.mrb[2].mxu0 %vm396_vm8, %v2055_v35  ;;  %vm645_vm15 = vcmp.eq.s32.totalorder %v2127_v44, 1  ;;  %v1297_v44 = vld [vmem:[%s2482_s6] sm:$0xff] }
  0xc0   :  { %1219 = vmatprep.mubr.f32.mxu0 %v1798_v14 }
 0x179   :  { %v2109_v35 = vpop.f32.mrb[0].mxu0 }
 0x17a   :  { %v646_v28 = vsel %vm640_vm10, %v2109_v35, 0.0  ;;  %v2114_v29 = vpop.f32.mrb[1].mxu0 }
 0x17b   :  { %v659_v30 = vmul.f32 %v646_v28, %v646_v28  ;;  %v647_v32 = vsel %vm2486_vm11, %v2114_v29, 0.0 }
 0x17c   :  { %v652_v33 = vadd.f32 %v647_v32, %v646_v28  ;;  %v660_v34 = vmul.f32 %v647_v32, %v647_v32 }
 0x17e   :  { %v665_v36 = vadd.f32 %v660_v34, %v659_v30 }
 0x18d   :  { %v537_v21 = vpop.f32.mrb[0].mxu1 }
 0x18e   :  { %v648_v46 = vsel %vm642_vm12, %v537_v21, 0.0  ;;  %v539_v47 = vpop.f32.mrb[1].mxu1 }
 0x18f   :  { %v653_v48 = vadd.f32 %v652_v33, %v648_v46  ;;  %v661_v49 = vmul.f32 %v648_v46, %v648_v46  ;;  %v649_v51 = vsel %vm643_vm13, %v539_v47, 0.0 }
 0x190   :  { %v662_v24 = vmul.f32 %v649_v51, %v649_v51 }
 0x191   :  { %v666_v25 = vadd.f32 %v665_v36, %v661_v49  ;;  %v654_v7 = vadd.f32 %v653_v48, %v649_v51 }
 0x192   :  { %v608_v6 = vpop.f32.mrb[2].mxu0 }
 0x193   :  { %v667_v50 = vadd.f32 %v666_v25, %v662_v24  ;;  %v650_v52 = vsel %vm2485_vm14, %v608_v6, 0.0  ;;  %v610_v54 = vpop.f32.mrb[3].mxu0 }
 0x194   :  { %v655_v55 = vadd.f32 %v654_v7, %v650_v52  ;;  %v663_v56 = vmul.f32 %v650_v52, %v650_v52  ;;  %v651_v4 = vsel %vm645_vm15, %v610_v54, 0.0 }
 0x195   :  { %v664_v11 = vmul.f32 %v651_v4, %v651_v4 }
 0x196   :  { %v656_v12 = vadd.f32 %v655_v55, %v651_v4  ;;  %v668_v0 = vadd.f32 %v667_v50, %v663_v56 }
 0x198   :  { %657 = vadd.xlane.f32.xlu0 %v656_v12  ;;  %v669_v58 = vadd.f32 %v668_v0, %v664_v11 }
 0x19a   :  { %670 = vadd.xlane.f32.xlu1 %v669_v58 }
 0x225   :  { %v658_v59 = vpop.xlane.xlu0 %657 }
 0x226   :  { %v672_v61 = vmul.f32 0.001953125, %v658_v59 }
 0x227   :  { %v671_v63 = vpop.xlane.xlu1 %670 }
 0x228   :  { %v674_v42 = vmul.f32 %v672_v61, %v672_v61  ;;  %v673_v57 = vmul.f32 0.001953125, %v671_v63 }
 0x22a   :  { %v675_v60 = vsub.f32 %v673_v57, %v674_v42 }
 0x22c   :  { %v676_v45 = vmax.f32 %v675_v60, 0.0 }
 0x22e   :  { %v677_v3 = vadd.f32 1e-05, %v676_v45 }
 0x230   :  { %1786 = vrsqrt.f32 %v677_v3 }
 0x23a   :  { %v1787_v62 = vpop.eup %1786 }
 0x23b   :  { %v679_v5 = vmul.f32 %v1787_v62, %v613_v1 }
 0x23d   :  { %684 = vperm.xlu0 %1644, %v679_v5   ;;  %v680_v8 = vmul.f32 %v679_v5, %v672_v61 }
 0x23f   :  { %v681_v9 = vsub.f32 %v614_v2, %v680_v8 }
 0x241   :  { %695 = vperm.xlu1 %1645, %v681_v9   ;;  %1657 = vrot.lane.b32.xlu0 %v1798_v14, %s1792_s15 }
 0x245   :  { %1647 = vrot.lane.b32.xlu1 %v1798_v14, %s1790_s13 }
 0x249   :  { %1652 = vrot.lane.b32.xlu1 %v1798_v14, %s1791_s14 }
 0x24d   :  { %1662 = vrot.lane.b32.xlu1 %v1798_v14, %s1793_s16 }
 0x251   :  { %867 = vrot.lane.b32.xlu1 %v1798_v14, %s1797_s28 }
 0x2bc   :  { %v685_v10 = vpop.permute.xlu0 %684 }
 0x2bd   :  { %v687_v13 = vmul.f32 %v685_v10, %v2109_v35  ;;  %v688_v31 = vmul.f32 %v685_v10, %v2114_v29  ;;  %v689_v15 = vmul.f32 %v685_v10, %v537_v21  ;;  %v690_v38 = vmul.f32 %v685_v10, %v539_v47 }
 0x2be   :  { %v691_v21 = vmul.f32 %v685_v10, %v608_v6  ;;  %v692_v46 = vmul.f32 %v685_v10, %v610_v54 }
 0x2c0   :  { %v696_v16 = vpop.permute.xlu1 %695  ;;  %v2227_v58 = vpop.permute.xlu0 %1657 }
 0x2c1   :  { %v698_v17 = vadd.f32 %v696_v16, %v687_v13  ;;  %v699_v37 = vadd.f32 %v696_v16, %v688_v31  ;;  %v700_v39 = vadd.f32 %v696_v16, %v689_v15  ;;  %v701_v18 = vadd.f32 %v696_v16, %v690_v38 }
 0x2c2   :  { %v702_v47 = vadd.f32 %v696_v16, %v691_v21  ;;  %v703_v48 = vadd.f32 %v696_v16, %v692_v46 }
 0x2c3   :  { %v704_v22 = vmul.f32 0.2, %v698_v17  ;;  %v705_v28 = vmul.f32 0.2, %v699_v37  ;;  %v706_v30 = vmul.f32 0.2, %v700_v39 }
 0x2c4   :  { %v707_v32 = vmul.f32 0.2, %v701_v18  ;;  %v708_v24 = vmul.f32 0.2, %v702_v47  ;;  %v709_v25 = vmul.f32 0.2, %v703_v48  ;;  %v2221_v11 = vpop.permute.xlu1 %1647 }
 0x2c5   :  { %v2157_v33 = vmax.f32 %v698_v17, %v704_v22  ;;  %v2159_v34 = vmax.f32 %v699_v37, %v705_v28  ;;  %v2161_v36 = vmax.f32 %v700_v39, %v706_v30  ;;  %v1649_v3 = vunpack.i.l.bf16 %v2221_v11 }
 0x2c6   :  { %v2172_v41 = vmax.f32 %v701_v18, %v707_v32  ;;  %v2183_v6 = vmax.f32 %v702_v47, %v708_v24  ;;  %v2185_v50 = vmax.f32 %v703_v48, %v709_v25  ;;  %v1659_v37 = vunpack.i.l.bf16 %v2227_v58 }
 0x2c7   :  { %v716_v35 = vsel %vm640_vm10, %v2157_v33, 0.0  ;;  %v717_v29 = vsel %vm2486_vm11, %v2159_v34, 0.0  ;;  %v718_v20 = vsel %vm642_vm12, %v2161_v36, 0.0 }
 0x2c8   :  { %v1686_v27 = vpack.i.bf16 %v718_v20, %v717_v29  ;;  %v1666_v19 = vpack.i.bf16 %v717_v29, %v716_v35  ;;  %v719_v49 = vsel %vm643_vm13, %v2172_v41, 0.0  ;;  %v720_v52 = vsel %vm2485_vm14, %v2183_v6, 0.0  ;;  %v2223_v12 = vpop.permute.xlu1 %1652  ;;  %vm1448_vm14 = vmpackc.low %vm1800_vm9, %vm2486_vm11 }
 0x2c9   :  { %v1706_v51 = vpack.i.bf16 %v719_v49, %v716_v35  ;;  %v1716_v7 = vpack.i.bf16 %v718_v20, %v719_v49  ;;  %v721_v54 = vsel %vm645_vm15, %v2185_v50, 0.0  ;;  %v1771_v4 = vpack.i.bf16 %v1798_v14, %v720_v52  ;;  %vm1451_vm11 = vmpackc.low %vm1800_vm9, %vm640_vm10 }
 0x2ca   :  { %1687 = vrot.lane.b32.xlu0 %v1686_v27, %s1794_s21  ;;  %1667 = vrot.lane.b32.xlu1 %v1666_v19, %s1790_s13  ;;  %v1726_v55 = vpack.i.bf16 %v721_v54, %v720_v52  ;;  %v1761_v56 = vpack.i.bf16 %v1798_v14, %v721_v54  ;;  %v1654_v1 = vunpack.i.l.bf16 %v2223_v12 }
 0x2cc   :  { %v2225_v0 = vpop.permute.xlu1 %1662 }
 0x2cd   :  { %v1664_v30 = vunpack.i.l.bf16 %v2225_v0 }
 0x2ce   :  { %1697 = vrot.lane.b32.xlu0 %v1686_v27, %s1795_s22  ;;  %1672 = vrot.lane.b32.xlu1 %v1666_v19, %s1791_s14 }
 0x2d0   :  { %v2229_v59 = vpop.permute.xlu1 %867 }
 0x2d2   :  { %1707 = vrot.lane.b32.xlu0 %v1706_v51, %s1795_s22  ;;  %1677 = vrot.lane.b32.xlu1 %v1666_v19, %s1792_s15 }
 0x2d6   :  { %1717 = vrot.lane.b32.xlu0 %v1716_v7, %s1790_s13  ;;  %1682 = vrot.lane.b32.xlu1 %v1666_v19, %s1793_s16 }
 0x2da   :  { %863 = vrot.lane.b32.xlu0 %v717_v29, %s1797_s28  ;;  %1692 = vrot.lane.b32.xlu1 %v1706_v51, %s1794_s21 }
 0x2de   :  { %1727 = vrot.lane.b32.xlu0 %v1726_v55, %s1790_s13  ;;  %1702 = vrot.lane.b32.xlu1 %v1686_v27, %s1796_s23 }
 0x2e2   :  { %1737 = vrot.lane.b32.xlu0 %v1716_v7, %s1792_s15  ;;  %1712 = vrot.lane.b32.xlu1 %v1706_v51, %s1796_s23 }
 0x2e6   :  { %861 = vrot.lane.b32.xlu0 %v716_v35, %s1797_s28  ;;  %1722 = vrot.lane.b32.xlu1 %v1716_v7, %s1791_s14 }
 0x2ea   :  { %1752 = vrot.lane.b32.xlu0 %v1726_v55, %s1793_s16  ;;  %865 = vrot.lane.b32.xlu1 %v718_v20, %s1797_s28 }
 0x2ee   :  { %1762 = vrot.lane.b32.xlu0 %v1761_v56, %s1794_s21  ;;  %1732 = vrot.lane.b32.xlu1 %v1726_v55, %s1791_s14 }
 0x2f2   :  { %1772 = vrot.lane.b32.xlu0 %v1771_v4, %s1796_s23  ;;  %1742 = vrot.lane.b32.xlu1 %v1716_v7, %s1793_s16 }
 0x2f6   :  { %1782 = vrot.lane.b32.xlu0 %v1761_v56, %s1796_s23  ;;  %1747 = vrot.lane.b32.xlu1 %v1726_v55, %s1792_s15 }
 0x2fa   :  { %1012 = vrot.lane.b32.xlu0 %v720_v52, %s1797_s28  ;;  %1757 = vrot.lane.b32.xlu1 %v1771_v4, %s1794_s21 }
 0x2fe   :  { %1014 = vrot.lane.b32.xlu0 %v721_v54, %s1797_s28  ;;  %1767 = vrot.lane.b32.xlu1 %v1771_v4, %s1795_s22 }
 0x302   :  { %1777 = vrot.lane.b32.xlu1 %v1761_v56, %s1795_s22 }
 0x306   :  { %1010 = vrot.lane.b32.xlu1 %v719_v49, %s1797_s28 }
 0x30a   :  { %1016 = vrot.lane.b32.xlu1 %v1798_v14, %s1797_s28 }
 0x33c   :  { %v2231_v61 = vpop.permute.xlu0 %1687  ;;  %v2233_v63 = vpop.permute.xlu1 %1667 }
 0x33d   :  { %v1670_v42 = vunpack.i.h.bf16 %v2233_v63  ;;  %v1669_v57 = vunpack.i.l.bf16 %v2233_v63  ;;  %v1690_v16 = vunpack.i.h.bf16 %v2231_v61  ;;  %v1689_v17 = vunpack.i.l.bf16 %v2231_v61  ;;  %v2331_v63 = vld [vmem:[%s2481_s5] sm:$0xff] }
 0x33f   :  { %v746_v2 = vsel %vm53_vm0, %v1649_v3, %v1669_v57  ;;  %v747_v10 = vsel %vm53_vm0, %v1669_v57, %v1670_v42  ;;  %v819_v29 = vsel %vm129_vm4, %v1689_v17, %v1690_v16 }
 0x340   :  { %v2237_v60 = vpop.permute.xlu0 %1697  ;;  %v2239_v45 = vpop.permute.xlu1 %1672  ;;  %v1447_v24 = vpack.c.bf16 %v819_v29, %v2159_v34 }
 0x341   :  { %v1675_v62 = vunpack.i.h.bf16 %v2239_v45  ;;  %v1674_v5 = vunpack.i.l.bf16 %v2239_v45  ;;  %v1700_v25 = vunpack.i.h.bf16 %v2237_v60  ;;  %v1699_v7 = vunpack.i.l.bf16 %v2237_v60 }
 0x343   :  { %v763_v8 = vsel %vm71_vm1, %v1654_v1, %v1674_v5  ;;  %v764_v13 = vsel %vm71_vm1, %v1674_v5, %v1675_v62 }
 0x344   :  { %v2247_v9 = vpop.permute.xlu0 %1707  ;;  %v1441_v31 = vpack.c.bf16 %v763_v8, %v746_v2  ;;  %v2255_v15 = vpop.permute.xlu1 %1677  ;;  %v1439_v38 = vpack.c.bf16 %v764_v13, %v747_v10 }
 0x345   :  { %v1680_v39 = vunpack.i.h.bf16 %v2255_v15  ;;  %v1679_v18 = vunpack.i.l.bf16 %v2255_v15  ;;  %v1709_v57 = vunpack.i.l.bf16 %v2247_v9 }
 0x346   :  { %1440 = vmatprep.subr.bf16.mxu1 %v1439_v38 }
 0x347   :  { %1442 = vmatpush1.bf16.msra.mxu1 %v1441_v31  ;;  %v780_v20 = vsel %vm89_vm2, %v1659_v37, %v1679_v18  ;;  %v781_v21 = vsel %vm89_vm2, %v1679_v18, %v1680_v39  ;;  %v835_v10 = vsel %vm147_vm5, %v1709_v57, %v1699_v7 }
 0x348   :  { %v2262_v22 = vpop.permute.xlu0 %1717  ;;  %v2264_v28 = vpop.permute.xlu1 %1682 }
 0x349   :  { %v1685_v32 = vunpack.i.h.bf16 %v2264_v28  ;;  %v1684_v35 = vunpack.i.l.bf16 %v2264_v28  ;;  %v1720_v13 = vunpack.i.h.bf16 %v2262_v22  ;;  %v1719_v31 = vunpack.i.l.bf16 %v2262_v22 }
 0x34b   :  { %v797_v27 = vsel %vm107_vm3, %v1664_v30, %v1684_v35  ;;  %v798_v46 = vsel %vm107_vm3, %v1684_v35, %v1685_v32  ;;  %v1650_v30 = vunpack.i.h.bf16 %v2221_v11  ;;  %v1655_v35 = vunpack.i.h.bf16 %v2223_v12 }
 0x34c   :  { %v864_v19 = vpop.permute.xlu0 %863  ;;  %v1445_v47 = vpack.c.bf16 %v797_v27, %v780_v20  ;;  %v2280_v48 = vpop.permute.xlu1 %1692  ;;  %v1443_v49 = vpack.c.bf16 %v798_v46, %v781_v21  ;;  %v748_v27 = vsel %vm53_vm0, %v1670_v42, %v1720_v13 }
 0x34d   :  { %v1694_v51 = vunpack.i.l.bf16 %v2280_v48  ;;  %v895_v21 = vsel %vm53_vm0, %v1650_v30, %v1719_v31 }
 0x34e   :  { %1444 = vmatprep.subr.bf16.mxu1 %v1443_v49 }
 0x34f   :  { %v818_v52 = vsel %vm129_vm4, %v1694_v51, %v1689_v17  ;;  %1446 = vmatpush1.bf16.msra.mxu1 %v1445_v47 }
 0x350   :  { %v1728_v54 = vpop.permute.xlu0 %1727  ;;  %v1450_v55 = vpack.c.bf16 %v818_v52, %v2157_v33  ;;  %v2291_v56 = vpop.permute.xlu1 %1702  ;;  %1449 = vmatprep.subr.msk.bf16.mxu1 %vm1448_vm14, %v1447_v24  ;;  %v836_v33 = vsel %vm147_vm5, %v1699_v7, %v1700_v25 }
 0x351   :  { %v1705_v34 = vunpack.i.h.bf16 %v2291_v56  ;;  %v1704_v4 = vunpack.i.l.bf16 %v2291_v56  ;;  %v1730_v45 = vunpack.i.h.bf16 %v1728_v54 }
 0x353   :  { %1452 = vmatpush1.bf16.msk.msra.mxu1 %vm1451_vm11, %v1450_v55  ;;  %v853_v1 = vsel %vm165_vm6, %v1704_v4, %v1705_v34 }
 0x354   :  { %v2299_v3 = vpop.permute.xlu0 %1737  ;;  %v2307_v5 = vpop.permute.xlu1 %1712  ;;  %v1453_v2 = vpack.c.bf16 %v853_v1, %v836_v33 }
 0x355   :  { %v1714_v8 = vunpack.i.l.bf16 %v2307_v5  ;;  %v1740_v55 = vunpack.i.h.bf16 %v2299_v3 }
 0x356   :  { %1454 = vmatprep.subr.bf16.mxu1 %v1453_v2  ;;  %v1660_v2 = vunpack.i.h.bf16 %v2227_v58 }
 0x357   :  { %v852_v38 = vsel %vm165_vm6, %v1714_v8, %v1704_v4  ;;  %v1739_v4 = vunpack.i.l.bf16 %v2299_v3  ;;  %v782_v3 = vsel %vm89_vm2, %v1680_v39, %v1740_v55 }
 0x358   :  { %v862_v17 = vpop.permute.xlu0 %861  ;;  %v1455_v37 = vpack.c.bf16 %v852_v38, %v835_v10  ;;  %v1723_v18 = vpop.permute.xlu1 %1722 }
 0x359   :  { %v1725_v29 = vunpack.i.h.bf16 %v1723_v18  ;;  %v1724_v20 = vunpack.i.l.bf16 %v1723_v18  ;;  %v869_v42 = vsel %vm183_vm7, %v862_v17, %v864_v19  ;;  %v929_v18 = vsel %vm89_vm2, %v1660_v2, %v1739_v4 }
 0x35a   :  { %1456 = vmatpush1.bf16.msra.mxu1 %v1455_v37 }
 0x35b   :  { %v765_v22 = vsel %vm71_vm1, %v1675_v62, %v1725_v29  ;;  %v912_v46 = vsel %vm71_vm1, %v1655_v35, %v1724_v20  ;;  %v1729_v62 = vunpack.i.l.bf16 %v1728_v54 }
 0x35c   :  { %v1459_v47 = vpack.c.bf16 %v765_v22, %v748_v27  ;;  %v2324_v49 = vpop.permute.xlu1 %865  ;;  %v1457_v11 = vpack.c.bf16 %v912_v46, %v895_v21  ;;  %v1753_v12 = vpop.permute.xlu0 %1752 }
 0x35d   :  { %v870_v51 = vsel %vm183_vm7, %v864_v19, %v2324_v49  ;;  %v896_v19 = vsel %vm53_vm0, %v1719_v31, %v1729_v62  ;;  %v897_v54 = vsel %vm53_vm0, %v1729_v62, %v1730_v45  ;;  %v1755_v31 = vunpack.i.h.bf16 %v1753_v12  ;;  %vm2362_vm0 = vmpackc.low %vm1800_vm9, %vm645_vm15 }
 0x35e   :  { %1100 = vmatprep.subr.mxu1 %v870_v51  ;;  %1458 = vmatprep.subr.bf16.mxu0 %v1457_v11  ;;  %v1754_v37 = vunpack.i.l.bf16 %v1753_v12 }
 0x35f   :  { %1101 = vmatpush1.msra.mxu1 %v869_v42  ;;  %1460 = vmatpush1.bf16.msra.mxu0 %v1459_v47  ;;  %v1695_v42 = vunpack.i.h.bf16 %v2280_v48 }
 0x360   :  { %v1733_v24 = vpop.permute.xlu1 %1732  ;;  %1382 = vmatmul.mubr.msk.f32.vlgmr.msra.gmra.mrb[2].mxu1 %vm396_vm8, %v2331_v63  ;;  %v1763_v57 = vpop.permute.xlu0 %1762  ;;  %v948_v21 = vsel %vm107_vm3, %v1754_v37, %v1755_v31 }
 0x361   :  { %v1735_v7 = vunpack.i.h.bf16 %v1733_v24  ;;  %v1734_v52 = vunpack.i.l.bf16 %v1733_v24  ;;  %1290 = vmatprep.mubr.f32.mxu1 %v1798_v14  ;;  %v1665_v14 = vunpack.i.h.bf16 %v2225_v0  ;;  %v1765_v30 = vunpack.i.h.bf16 %v1763_v57 }
 0x362   :  { %v1764_v35 = vunpack.i.l.bf16 %v1763_v57 }
 0x363   :  { %v913_v33 = vsel %vm71_vm1, %v1724_v20, %v1734_v52  ;;  %v914_v1 = vsel %vm71_vm1, %v1734_v52, %v1735_v7  ;;  %vm2370_vm1 = vmpackc.low %vm1800_vm9, %vm643_vm13 }
 0x364   :  { %v1477_v8 = vpack.c.bf16 %v913_v33, %v896_v19  ;;  %v1743_v10 = vpop.permute.xlu1 %1742  ;;  %v1475_v13 = vpack.c.bf16 %v914_v1, %v897_v54  ;;  %v1773_v15 = vpop.permute.xlu0 %1772  ;;  %v969_v46 = vsel %vm129_vm4, %v1764_v35, %v1765_v30  ;;  %v1715_v54 = vunpack.i.h.bf16 %v2307_v5 }
 0x365   :  { %v1745_v38 = vunpack.i.h.bf16 %v1743_v10  ;;  %v1744_v17 = vunpack.i.l.bf16 %v1743_v10  ;;  %v1483_v7 = vpack.c.bf16 %v969_v46, %v2185_v50  ;;  %v1775_v52 = vunpack.i.h.bf16 %v1773_v15 }
 0x366   :  { %1476 = vmatprep.subr.bf16.mxu1 %v1475_v13  ;;  %v1774_v55 = vunpack.i.l.bf16 %v1773_v15 }
 0x367   :  { %v799_v58 = vsel %vm107_vm3, %v1685_v32, %v1745_v38  ;;  %1478 = vmatpush1.bf16.msra.mxu1 %v1477_v8  ;;  %v946_v0 = vsel %vm107_vm3, %v1665_v14, %v1744_v17  ;;  %v947_v47 = vsel %vm107_vm3, %v1744_v17, %v1754_v37  ;;  %vm2493_vm3 = vcmp.eq.s32.totalorder %v2125_v43, 1 }
 0x368   :  { %v1463_v29 = vpack.c.bf16 %v799_v58, %v782_v3  ;;  %v1748_v20 = vpop.permute.xlu1 %1747  ;;  %v1461_v27 = vpack.c.bf16 %v946_v0, %v929_v18  ;;  %v1783_v48 = vpop.permute.xlu0 %1782  ;;  %v1710_v8 = vunpack.i.h.bf16 %v2247_v9 }
 0x369   :  { %v1750_v22 = vunpack.i.h.bf16 %v1748_v20  ;;  %v1749_v39 = vunpack.i.l.bf16 %v1748_v20  ;;  %v1784_v5 = vunpack.i.l.bf16 %v1783_v48 }
 0x36a   :  { %1462 = vmatprep.subr.bf16.mxu0 %v1461_v27 }
 0x36b   :  { %v930_v28 = vsel %vm89_vm2, %v1739_v4, %v1749_v39  ;;  %1464 = vmatpush1.bf16.msra.mxu0 %v1463_v29  ;;  %v931_v32 = vsel %vm89_vm2, %v1749_v39, %v1750_v22  ;;  %vm2382_vm2 = vmpackc.low %vm1800_vm9, %vm642_vm12  ;;  %v1002_v37 = vsel %vm165_vm6, %v1774_v55, %v1784_v5  ;;  %v871_v29 = vsel %vm183_vm7, %v2324_v49, %v2229_v59 }
 0x36c   :  { %v1481_v11 = vpack.c.bf16 %v947_v47, %v930_v28  ;;  %v1758_v12 = vpop.permute.xlu1 %1757  ;;  %v1479_v51 = vpack.c.bf16 %v948_v21, %v931_v32  ;;  %v1013_v17 = vpop.permute.xlu0 %1012 }
 0x36d   :  { %v1760_v45 = vunpack.i.h.bf16 %v1758_v12  ;;  %v1759_v62 = vunpack.i.l.bf16 %v1758_v12 }
 0x36e   :  { %1480 = vmatprep.subr.bf16.mxu1 %v1479_v51 }
 0x36f   :  { %v820_v19 = vsel %vm129_vm4, %v1690_v16, %v1760_v45  ;;  %v967_v57 = vsel %vm129_vm4, %v1695_v42, %v1759_v62  ;;  %v968_v33 = vsel %vm129_vm4, %v1759_v62, %v1764_v35  ;;  %1482 = vmatpush1.bf16.msra.mxu1 %v1481_v11  ;;  %vm1487_vm4 = vmpackc.low %vm1800_vm9, %vm2493_vm3 }
 0x370   :  { %v1468_v1 = vpack.c.bf16 %v820_v19, %v2161_v36  ;;  %v1465_v61 = vpack.c.bf16 %v967_v57, %v2172_v41  ;;  %v1486_v16 = vpack.c.bf16 %v968_v33, %v2183_v6  ;;  %v1768_v2 = vpop.permute.xlu1 %1767  ;;  %1485 = vmatprep.subr.msk.bf16.mxu1 %vm2362_vm0, %v1483_v7  ;;  %v854_v36 = vsel %vm165_vm6, %v1705_v34, %v1775_v52  ;;  %v1015_v20 = vpop.permute.xlu0 %1014 }
 0x371   :  { %v1770_v10 = vunpack.i.h.bf16 %v1768_v2  ;;  %v1769_v13 = vunpack.i.l.bf16 %v1768_v2  ;;  %v1001_v41 = vsel %vm165_vm6, %v1715_v54, %v1774_v55  ;;  %v1785_v6 = vunpack.i.h.bf16 %v1783_v48 }
 0x372   :  { %1467 = vmatprep.subr.msk.bf16.mxu0 %vm2370_vm1, %v1465_v61  ;;  %v1019_v22 = vsel %vm183_vm7, %v1013_v17, %v1015_v20 }
 0x373   :  { %v837_v14 = vsel %vm147_vm5, %v1700_v25, %v1770_v10  ;;  %1470 = vmatpush1.bf16.msk.msra.mxu0 %vm2382_vm2, %v1468_v1  ;;  %1488 = vmatpush1.bf16.msk.msra.mxu1 %vm1487_vm4, %v1486_v16  ;;  %v984_v9 = vsel %vm147_vm5, %v1710_v8, %v1769_v13  ;;  %v1003_v25 = vsel %vm165_vm6, %v1784_v5, %v1785_v6  ;;  %vm2495_vm6 = vmmov %vm2493_vm3 }
 0x374   :  { %v1473_v56 = vpack.c.bf16 %v854_v36, %v837_v14  ;;  %v1778_v38 = vpop.permute.xlu1 %1777  ;;  %v1471_v34 = vpack.c.bf16 %v1001_v41, %v984_v9  ;;  %v1298_v36 = vld [vmem:[%s2483_s7] sm:$0xff] }
 0x375   :  { %v1780_v3 = vunpack.i.h.bf16 %v1778_v38  ;;  %v1779_v31 = vunpack.i.l.bf16 %v1778_v38 }
 0x376   :  { %1472 = vmatprep.subr.bf16.mxu0 %v1471_v34  ;;  %v1357_v34 = vld [vmem:[%s2476_s0 + $0x8] sm:$0xff] }
 0x377   :  { %v985_v18 = vsel %vm147_vm5, %v1769_v13, %v1779_v31  ;;  %1474 = vmatpush1.bf16.msra.mxu0 %v1473_v56  ;;  %v986_v60 = vsel %vm147_vm5, %v1779_v31, %v1780_v3  ;;  %vm2494_vm5 = vcmp.eq.s32.totalorder %v2105_v26, 1  ;;  %v1358_v31 = vld [vmem:[%s2476_s0 + $0x10] sm:$0xff] }
 0x378   :  { %v1491_v30 = vpack.c.bf16 %v1002_v37, %v985_v18  ;;  %v1011_v35 = vpop.permute.xlu1 %1010  ;;  %v1489_v58 = vpack.c.bf16 %v1003_v25, %v986_v60  ;;  %v1359_v37 = vld [vmem:[%s2476_s0 + $0x18] sm:$0xff]  ;;  %v1366_v18 = vld [vmem:[%s2476_s0 + $0x30] sm:$0xff] }
 0x379   :  { %v1018_v0 = vsel %vm183_vm7, %v1011_v35, %v1013_v17  ;;  %v1367_v25 = vld [vmem:[%s2476_s0 + $0x38] sm:$0xff] }
 0x37a   :  { %1171 = vmatprep.subr.mxu0 %v1018_v0  ;;  %1490 = vmatprep.subr.bf16.mxu1 %v1489_v58 }
 0x37b   :  { %1172 = vmatpush1.msra.mxu0 %v871_v29  ;;  %1492 = vmatpush1.bf16.msra.mxu1 %v1491_v30  ;;  %v1368_v30 = vld [vmem:[%s2476_s0 + $0x40] sm:$0xff] }
 0x37c   :  { %v1017_v27 = vpop.permute.xlu1 %1016  ;;  %1383 = vmatmul.mubr.msk.f32.vlgmr.msra.gmra.mrb[4].mxu0 %vm396_vm8, %v2331_v63 }
 0x37d   :  { %v1020_v15 = vsel %vm183_vm7, %v1015_v20, %v1017_v27 }
 0x37e   :  { %1242 = vmatprep.subr.mxu1 %v1020_v15 }
 0x37f   :  { %1243 = vmatpush1.msra.mxu1 %v1019_v22 }
 0x380   :  { %1384 = vmatmul.mubr.msk.f32.vlgmr.msra.gmra.mrb[4].mxu1 %vm396_vm8, %v2331_v63 }
 0x433   :  { %v1150_v39 = vpop.f32.mrb[2].mxu1 }
 0x434   :  { %v1299_v59 = vsel %vm640_vm10, %v1150_v39, 0.0  ;;  %v1152_v49 = vpop.f32.mrb[3].mxu1 }
 0x435   :  { %v1312_v21 = vmul.f32 %v1299_v59, %v1299_v59  ;;  %v1300_v46 = vsel %vm2494_vm5, %v1152_v49, 0.0 }
 0x436   :  { %v1305_v47 = vadd.f32 %v1300_v46, %v1299_v59  ;;  %v1313_v28 = vmul.f32 %v1300_v46, %v1300_v46 }
 0x438   :  { %v1318_v32 = vadd.f32 %v1313_v28, %v1312_v21 }
 0x44f   :  { %v1221_v11 = vpop.f32.mrb[4].mxu0 }
 0x450   :  { %v1301_v12 = vsel %vm642_vm12, %v1221_v11, 0.0  ;;  %v1223_v51 = vpop.f32.mrb[5].mxu0 }
 0x451   :  { %v1306_v42 = vadd.f32 %v1305_v47, %v1301_v12  ;;  %v1314_v45 = vmul.f32 %v1301_v12, %v1301_v12  ;;  %v1302_v63 = vsel %vm643_vm13, %v1223_v51, 0.0 }
 0x452   :  { %v1315_v23 = vmul.f32 %v1302_v63, %v1302_v63 }
 0x453   :  { %v1319_v62 = vadd.f32 %v1318_v32, %v1314_v45  ;;  %v1307_v24 = vadd.f32 %v1306_v42, %v1302_v63  ;;  %v1292_v7 = vpop.f32.mrb[4].mxu1 }
 0x454   :  { %v1303_v26 = vsel %vm2495_vm6, %v1292_v7, 0.0  ;;  %v1294_v52 = vpop.f32.mrb[5].mxu1 }
 0x455   :  { %v1320_v55 = vadd.f32 %v1319_v62, %v1315_v23  ;;  %v1308_v4 = vadd.f32 %v1307_v24, %v1303_v26  ;;  %v1316_v48 = vmul.f32 %v1303_v26, %v1303_v26  ;;  %v1304_v40 = vsel %vm645_vm15, %v1294_v52, 0.0 }
 0x456   :  { %v1317_v19 = vmul.f32 %v1304_v40, %v1304_v40 }
 0x457   :  { %v1309_v57 = vadd.f32 %v1308_v4, %v1304_v40  ;;  %v1321_v33 = vadd.f32 %v1320_v55, %v1316_v48 }
 0x459   :  { %1310 = vadd.xlane.f32.xlu0 %v1309_v57  ;;  %v1322_v53 = vadd.f32 %v1321_v33, %v1317_v19 }
 0x45b   :  { %1323 = vadd.xlane.f32.xlu1 %v1322_v53 }
 0x4e6   :  { %v1311_v50 = vpop.xlane.xlu0 %1310 }
 0x4e7   :  { %v1325_v54 = vmul.f32 0.001953125, %v1311_v50 }
 0x4e8   :  { %v1324_v1 = vpop.xlane.xlu1 %1323 }
 0x4e9   :  { %v1327_v61 = vmul.f32 %v1325_v54, %v1325_v54  ;;  %v1326_v16 = vmul.f32 0.001953125, %v1324_v1 }
 0x4eb   :  { %v1328_v43 = vsub.f32 %v1326_v16, %v1327_v61 }
 0x4ed   :  { %v1329_v2 = vmax.f32 %v1328_v43, 0.0 }
 0x4ef   :  { %v1330_v8 = vadd.f32 1e-05, %v1329_v2 }
 0x4f1   :  { %1788 = vrsqrt.f32 %v1330_v8 }
 0x4fb   :  { %v1789_v10 = vpop.eup %1788 }
 0x4fc   :  { %v1332_v13 = vmul.f32 %v1789_v10, %v1297_v44 }
 0x4fe   :  { %1337 = vperm.xlu0 %1644, %v1332_v13   ;;  %v1333_v41 = vmul.f32 %v1332_v13, %v1325_v54 }
 0x500   :  { %v1334_v6 = vsub.f32 %v1298_v36, %v1333_v41 }
 0x502   :  { %1348 = vperm.xlu1 %1645, %v1334_v6  }
 0x57d   :  { %v1338_v5 = vpop.permute.xlu0 %1337 }
 0x57e   :  { %v1340_v14 = vmul.f32 %v1338_v5, %v1150_v39  ;;  %v1341_v9 = vmul.f32 %v1338_v5, %v1152_v49  ;;  %v1342_v56 = vmul.f32 %v1338_v5, %v1221_v11  ;;  %v1343_v38 = vmul.f32 %v1338_v5, %v1223_v51 }
 0x57f   :  { %v1344_v17 = vmul.f32 %v1338_v5, %v1292_v7  ;;  %v1345_v3 = vmul.f32 %v1338_v5, %v1294_v52 }
 0x581   :  { %v1349_v60 = vpop.permute.xlu1 %1348 }
 0x582   :  { %v1351_v35 = vadd.f32 %v1349_v60, %v1340_v14  ;;  %v1352_v58 = vadd.f32 %v1349_v60, %v1341_v9  ;;  %v1353_v0 = vadd.f32 %v1349_v60, %v1342_v56  ;;  %v1354_v29 = vadd.f32 %v1349_v60, %v1343_v38 }
 0x583   :  { %v1355_v20 = vadd.f32 %v1349_v60, %v1344_v17  ;;  %v1356_v27 = vadd.f32 %v1349_v60, %v1345_v3 }
 0x584   :  { %v1360_v15 = vadd.f32 %v1357_v34, %v1351_v35  ;;  %v1361_v22 = vadd.f32 %v1358_v31, %v1352_v58  ;;  %v1362_v39 = vadd.f32 %v1359_v37, %v1353_v0  ;;  %v1369_v59 = vadd.f32 %v1366_v18, %v1354_v29 }
 0x585   :  { %v1370_v49 = vadd.f32 %v1367_v25, %v1355_v20  ;;  %v1371_v21 = vadd.f32 %v1368_v30, %v1356_v27 }
 0x586   :  { %1363 = vst [vmem:[%s2484_s8] sm:$0xff] %v1360_v15  ;;  %1364 = vst [vmem:[%s2484_s8 + $0x8] sm:$0xff] %v1361_v22 }
 0x587   :  { %1365 = vst [vmem:[%s2484_s8 + $0x10] sm:$0xff] %v1362_v39  ;;  %1372 = vst [vmem:[%s2484_s8 + $0x18] sm:$0xff] %v1369_v59 }
 0x588   :  { %1373 = vst [vmem:[%s2484_s8 + $0x20] sm:$0xff] %v1370_v49  ;;  %1374 = vst [vmem:[%s2484_s8 + $0x28] sm:$0xff] %v1371_v21 }

</bundles_post_ra>
